<compile_context>
chip_gen: v7x
topology: tpu7x:2x2x1
jax: 0.10.0
libtpu: 0.0.40
codegen_flags: <defaults>
</compile_context>

<pallas_src>
import jax
import jax.numpy as jnp
from jax.experimental import pallas as pl
from jax.experimental.pallas import tpu as pltpu

CNN_OUT = 64        # CnnNet output channels (matches Net(64))
MLP_HID = 128       # hidden width of the _ts_layer MLP
MAX_ROWS = 2048     # packed rows (2 tokens/row) per grid step (~2.6 MB/tile
                    # double-buffered: far under VMEM limits on v5e/v6e/v7x)


# ----------------------------------------------------------------------------
# Pallas kernel: fused  conv3x3(pad=1, per-patch) + ReLU  ->  MLP with GELU.
# Everything operates on two-tokens-per-128-lane-row with block-diag weights.
# ----------------------------------------------------------------------------
def _vit_body_kernel(a_ref, wc_ref, bc_ref, w1_ref, b1_ref, w2_ref, b2_ref,
                     o_ref):
    """a_ref : (R, 2*9*C)  bf16  im2col of two consecutive tokens per row
       wc_ref: (2*9*C,128) bf16  block-diagonal conv weight
       bc_ref: (1, 128)    f32
       w1_ref: (128, 256)  bf16  block-diagonal
       b1_ref: (1, 256)    f32
       w2_ref: (256, 128)  bf16  block-diagonal
       b2_ref: (1, 128)    f32
       o_ref : (R, 128)    f32   two tokens per row, lane-dense store
    """
    # Conv3x3 as a single K=2*9*C matmul, f32 accumulation, bias + ReLU.
    h = jnp.dot(a_ref[...], wc_ref[...], preferred_element_type=jnp.float32)
    h = jnp.maximum(h + bc_ref[...], 0.0)

    # _ts_layer (Net(64)): per-token MLP, two tokens per row.
    m = jnp.dot(h.astype(jnp.bfloat16), w1_ref[...],
                preferred_element_type=jnp.float32)
    m = jax.nn.gelu(m + b1_ref[...], approximate=True)   # tanh -> EUP slot
    out = jnp.dot(m.astype(jnp.bfloat16), w2_ref[...],
                  preferred_element_type=jnp.float32)
    o_ref[...] = (out + b2_ref[...]).astype(o_ref.dtype)


# ----------------------------------------------------------------------------
# Tiling / pallas_call wrapper
# ----------------------------------------------------------------------------
def _num_tensorcores():
    """2 only for v7x-style 2-TensorCore chips; v5e/v6e grids are serial."""
    try:
        kind = jax.devices()[0].device_kind.lower()
        if "v7" in kind or "tpu7" in kind or "7x" in kind:
            return 2
    except Exception:
        pass
    return 1


def _choose_tile(total_rows, min_tiles):
    """Balanced tiles: n_tiles = max(min_tiles, cdiv(rows, MAX_ROWS)), tile
    size = cdiv(rows, n_tiles) rounded up to 8 (sublane alignment)."""
    n_tiles = max(min_tiles, pl.cdiv(total_rows, MAX_ROWS))
    rows = pl.cdiv(total_rows, n_tiles)
    rows = max(8, ((rows + 7) // 8) * 8)
    return rows, n_tiles


def _fused_body(a2, wc2, bc2, w12, b12, w22, b22):
    """a2: (R0, 2*9*C) bf16 packed im2col rows. Returns (R0, 128) f32."""
    r0, k2 = a2.shape
    rows, n_tiles = _choose_tile(r0, _num_tensorcores())
    r_pad = rows * n_tiles
    if r_pad != r0:
        # Padded rows produce garbage that is sliced off below; never reused.
        a2 = jnp.pad(a2, ((0, r_pad - r0), (0, 0)))

    packed = pl.pallas_call(
        _vit_body_kernel,
        out_shape=jax.ShapeDtypeStruct((r_pad, 2 * CNN_OUT), jnp.float32),
        grid_spec=pltpu.PrefetchScalarGridSpec(
            num_scalar_prefetch=0,
            grid=(n_tiles,),
            in_specs=[
                pl.BlockSpec((rows, k2), lambda i: (i, 0)),
                pl.BlockSpec(wc2.shape, lambda i: (0, 0)),
                pl.BlockSpec(bc2.shape, lambda i: (0, 0)),
                pl.BlockSpec(w12.shape, lambda i: (0, 0)),
                pl.BlockSpec(b12.shape, lambda i: (0, 0)),
                pl.BlockSpec(w22.shape, lambda i: (0, 0)),
                pl.BlockSpec(b22.shape, lambda i: (0, 0)),
            ],
            out_specs=pl.BlockSpec((rows, 2 * CNN_OUT), lambda i: (i, 0)),
        ),
        compiler_params=pltpu.CompilerParams(
            dimension_semantics=("parallel",)),
    )(a2, wc2, bc2, w12, b12, w22, b22)

    return packed[:r0]


def _block_diag2(w):
    """(K, N) -> (2K, 2N) block-diagonal: two independent tokens per row."""
    k, n = w.shape
    z = jnp.zeros((k, n), w.dtype)
    top = jnp.concatenate([w, z], axis=1)
    bot = jnp.concatenate([z, w], axis=1)
    return jnp.concatenate([top, bot], axis=0)


# ----------------------------------------------------------------------------
# Parameters (deterministic, in-script)
# ----------------------------------------------------------------------------
def init_params(c_in, key):
    ks = jax.random.split(key, 6)
    wc = 0.05 * jax.random.normal(ks[0], (CNN_OUT, c_in, 3, 3), jnp.float32)
    bc = 0.05 * jax.random.normal(ks[1], (CNN_OUT,), jnp.float32)
    w1 = 0.05 * jax.random.normal(ks[2], (MLP_HID, CNN_OUT), jnp.float32)
    b1 = 0.05 * jax.random.normal(ks[3], (MLP_HID,), jnp.float32)
    w2 = 0.05 * jax.random.normal(ks[4], (CNN_OUT, MLP_HID), jnp.float32)
    b2 = 0.05 * jax.random.normal(ks[5], (CNN_OUT,), jnp.float32)
    return dict(wc=wc, bc=bc, w1=w1, b1=b1, w2=w2, b2=b2)


# ----------------------------------------------------------------------------
# VitNet.forward
# ----------------------------------------------------------------------------
@jax.jit
def vitnet_forward(x, params):
    """x: (N, C, H, W) float32 NCHW (PyTorch convention)."""
    n, c, H, W = x.shape
    h, w = H // 4, W // 4
    m_tokens = n * 16 * h * w        # always even (factor 16)

    # --- VIT patchify: (N,C,H,W) -> (N*16, h, w, C) channels-last patches ---
    p = x.reshape(n, c, 4, h, 4, w)
    p = jnp.transpose(p, (0, 2, 4, 3, 5, 1))          # (n, 4, 4, h, w, c)
    p = p.reshape(n * 16, h, w, c)

    # --- wrapper-side im2col for the per-patch 3x3 conv (zero padding) ------
    pp = jnp.pad(p, ((0, 0), (1, 1), (1, 1), (0, 0)))
    taps = [pp[:, dy:dy + h, dx:dx + w, :]
            for dy in range(3) for dx in range(3)]
    col = jnp.stack(taps, axis=3)                      # (n*16, h, w, 9, c)
    col = col.reshape(m_tokens, 9 * c)
    # Pack two consecutive tokens per row (free row-major reshape).
    a2 = col.reshape(m_tokens // 2, 2 * 9 * c).astype(jnp.bfloat16)

    # --- kernel-ready weights: bf16 matmul operands, f32 biases, blk-diag ---
    wc_mat = jnp.transpose(params["wc"], (2, 3, 1, 0)).reshape(9 * c, CNN_OUT)
    wc2 = _block_diag2(wc_mat).astype(jnp.bfloat16)              # (2*9c, 128)
    w12 = _block_diag2(params["w1"].T).astype(jnp.bfloat16)      # (128, 256)
    w22 = _block_diag2(params["w2"].T).astype(jnp.bfloat16)      # (256, 128)
    bc2 = jnp.tile(params["bc"], 2).reshape(1, 2 * CNN_OUT).astype(jnp.float32)
    b12 = jnp.tile(params["b1"], 2).reshape(1, 2 * MLP_HID).astype(jnp.float32)
    b22 = jnp.tile(params["b2"], 2).reshape(1, 2 * CNN_OUT).astype(jnp.float32)

    out2 = _fused_body(a2, wc2, bc2, w12, b12, w22, b22)   # (M/2, 128) f32
    out_tok = out2.reshape(m_tokens, CNN_OUT)              # free unpack

    # --- un-patchify back to NCHW (matches the PyTorch reshape/permute).
    # Kept for semantic fidelity; skip if a channels-last consumer exists. ---
    out = out_tok.reshape(n, 4, 4, h, w, CNN_OUT)
    out = jnp.transpose(out, (0, 5, 1, 3, 2, 4))           # (n, 64, 4, h, 4, w)
    return out.reshape(n, CNN_OUT, H, W)


if __name__ == "__main__":
    key = jax.random.PRNGKey(0)
    kx, kp = jax.random.split(key)

    N, C, H, W = 2, 4, 16, 16
    x = jax.random.normal(kx, (N, C, H, W), jnp.float32)
    params = init_params(C, kp)

    out = vitnet_forward(x, params)
    out = jax.block_until_ready(out)
    assert out.shape == (N, CNN_OUT, H, W), out.shape
    print("KERNEL_OK")
</pallas_src>

<mosaic_0001>
module attributes {stable_mosaic.version = 11 : i64} {
  func.func @_vit_body_kernel(%arg0: i32, %arg1: memref<256x72xbf16, #tpu.memory_space<vmem>>, %arg2: memref<72x128xbf16, #tpu.memory_space<vmem>>, %arg3: memref<1x128xf32, #tpu.memory_space<vmem>>, %arg4: memref<128x256xbf16, #tpu.memory_space<vmem>>, %arg5: memref<1x256xf32, #tpu.memory_space<vmem>>, %arg6: memref<256x128xbf16, #tpu.memory_space<vmem>>, %arg7: memref<1x128xf32, #tpu.memory_space<vmem>>, %arg8: memref<256x128xf32, #tpu.memory_space<vmem>>) attributes {dimension_semantics = [#tpu.dimension_semantics<parallel>], iteration_bounds = array<i64: 1>, scalar_prefetch = 0 : i64, scratch_operands = 0 : i64, tpu.core_type = #tpu.core_type<tc>, window_params = [{transform_indices = @transform_0, window_bounds = array<i64: 256, 72>}, {pipeline_mode = #tpu.pipeline_mode<synchronous>, transform_indices = @transform_1, window_bounds = array<i64: 72, 128>}, {pipeline_mode = #tpu.pipeline_mode<synchronous>, transform_indices = @transform_2, window_bounds = array<i64: 1, 128>}, {pipeline_mode = #tpu.pipeline_mode<synchronous>, transform_indices = @transform_3, window_bounds = array<i64: 128, 256>}, {pipeline_mode = #tpu.pipeline_mode<synchronous>, transform_indices = @transform_4, window_bounds = array<i64: 1, 256>}, {pipeline_mode = #tpu.pipeline_mode<synchronous>, transform_indices = @transform_5, window_bounds = array<i64: 256, 128>}, {pipeline_mode = #tpu.pipeline_mode<synchronous>, transform_indices = @transform_6, window_bounds = array<i64: 1, 128>}, {transform_indices = @transform_7, window_bounds = array<i64: 256, 128>}]} {
    %c0 = arith.constant 0 : index
    %c0_0 = arith.constant 0 : index
    %0 = vector.load %arg1[%c0, %c0_0] : memref<256x72xbf16, #tpu.memory_space<vmem>>, vector<256x72xbf16>
    %c0_1 = arith.constant 0 : index
    %c0_2 = arith.constant 0 : index
    %1 = vector.load %arg2[%c0_1, %c0_2] : memref<72x128xbf16, #tpu.memory_space<vmem>>, vector<72x128xbf16>
    %cst = arith.constant dense<0.000000e+00> : vector<256x128xf32>
    %2 = tpu.matmul %0, %1, %cst {dimension_numbers = #tpu.dot_dimension_numbers<[1], [0], [0], [1], [0, 0, 1, 1], [], []>} : vector<256x72xbf16>, vector<72x128xbf16>, vector<256x128xf32> -> vector<256x128xf32>
    %c0_3 = arith.constant 0 : index
    %c0_4 = arith.constant 0 : index
    %3 = vector.load %arg3[%c0_3, %c0_4] : memref<1x128xf32, #tpu.memory_space<vmem>>, vector<1x128xf32>
    %4 = vector.broadcast %3 : vector<1x128xf32> to vector<256x128xf32>
    %5 = arith.addf %2, %4 : vector<256x128xf32>
    %cst_5 = arith.constant 0.000000e+00 : f32
    %6 = vector.broadcast %cst_5 : f32 to vector<256x128xf32>
    %7 = arith.maximumf %5, %6 : vector<256x128xf32>
    %8 = arith.truncf %7 : vector<256x128xf32> to vector<256x128xbf16>
    %c0_6 = arith.constant 0 : index
    %c0_7 = arith.constant 0 : index
    %9 = vector.load %arg4[%c0_6, %c0_7] : memref<128x256xbf16, #tpu.memory_space<vmem>>, vector<128x256xbf16>
    %cst_8 = arith.constant dense<0.000000e+00> : vector<256x256xf32>
    %10 = tpu.matmul %8, %9, %cst_8 {dimension_numbers = #tpu.dot_dimension_numbers<[1], [0], [0], [1], [0, 0, 1, 1], [], []>} : vector<256x128xbf16>, vector<128x256xbf16>, vector<256x256xf32> -> vector<256x256xf32>
    %c0_9 = arith.constant 0 : index
    %c0_10 = arith.constant 0 : index
    %11 = vector.load %arg5[%c0_9, %c0_10] : memref<1x256xf32, #tpu.memory_space<vmem>>, vector<1x256xf32>
    %12 = vector.broadcast %11 : vector<1x256xf32> to vector<256x256xf32>
    %13 = arith.addf %10, %12 : vector<256x256xf32>
    %14 = arith.mulf %13, %13 : vector<256x256xf32>
    %15 = arith.mulf %13, %14 : vector<256x256xf32>
    %cst_11 = arith.constant 4.471500e-02 : f32
    %16 = vector.broadcast %cst_11 : f32 to vector<256x256xf32>
    %17 = arith.mulf %16, %15 : vector<256x256xf32>
    %18 = arith.addf %13, %17 : vector<256x256xf32>
    %cst_12 = arith.constant 0.797884583 : f32
    %19 = vector.broadcast %cst_12 : f32 to vector<256x256xf32>
    %20 = arith.mulf %19, %18 : vector<256x256xf32>
    %21 = math.tanh %20 : vector<256x256xf32>
    %cst_13 = arith.constant 1.000000e+00 : f32
    %22 = vector.broadcast %cst_13 : f32 to vector<256x256xf32>
    %23 = arith.addf %22, %21 : vector<256x256xf32>
    %cst_14 = arith.constant 5.000000e-01 : f32
    %24 = vector.broadcast %cst_14 : f32 to vector<256x256xf32>
    %25 = arith.mulf %24, %23 : vector<256x256xf32>
    %26 = arith.mulf %13, %25 : vector<256x256xf32>
    %27 = arith.truncf %26 : vector<256x256xf32> to vector<256x256xbf16>
    %c0_15 = arith.constant 0 : index
    %c0_16 = arith.constant 0 : index
    %28 = vector.load %arg6[%c0_15, %c0_16] : memref<256x128xbf16, #tpu.memory_space<vmem>>, vector<256x128xbf16>
    %cst_17 = arith.constant dense<0.000000e+00> : vector<256x128xf32>
    %29 = tpu.matmul %27, %28, %cst_17 {dimension_numbers = #tpu.dot_dimension_numbers<[1], [0], [0], [1], [0, 0, 1, 1], [], []>} : vector<256x256xbf16>, vector<256x128xbf16>, vector<256x128xf32> -> vector<256x128xf32>
    %c0_18 = arith.constant 0 : index
    %c0_19 = arith.constant 0 : index
    %30 = vector.load %arg7[%c0_18, %c0_19] : memref<1x128xf32, #tpu.memory_space<vmem>>, vector<1x128xf32>
    %31 = vector.broadcast %30 : vector<1x128xf32> to vector<256x128xf32>
    %32 = arith.addf %29, %31 : vector<256x128xf32>
    %c0_20 = arith.constant 0 : index
    %c0_21 = arith.constant 0 : index
    %33 = vector.load %arg8[%c0_20, %c0_21] : memref<256x128xf32, #tpu.memory_space<vmem>>, vector<256x128xf32>
    tpu.vector_store %arg8[%c0_20, %c0_21], %32 {strides = array<i32>} : memref<256x128xf32, #tpu.memory_space<vmem>>, vector<256x128xf32>,
    return
  }
  func.func @transform_0(%arg0: i32) -> (i32, i32) {
    %c0_i32 = arith.constant 0 : i32
    %c0_i32_0 = arith.constant 0 : i32
    return %arg0, %c0_i32 : i32, i32
  }
  func.func @transform_1(%arg0: i32) -> (i32, i32) {
    %c0_i32 = arith.constant 0 : i32
    %c0_i32_0 = arith.constant 0 : i32
    %c0_i32_1 = arith.constant 0 : i32
    return %c0_i32, %c0_i32_0 : i32, i32
  }
  func.func @transform_2(%arg0: i32) -> (i32, i32) {
    %c0_i32 = arith.constant 0 : i32
    %c0_i32_0 = arith.constant 0 : i32
    %c0_i32_1 = arith.constant 0 : i32
    return %c0_i32, %c0_i32_0 : i32, i32
  }
  func.func @transform_3(%arg0: i32) -> (i32, i32) {
    %c0_i32 = arith.constant 0 : i32
    %c0_i32_0 = arith.constant 0 : i32
    %c0_i32_1 = arith.constant 0 : i32
    return %c0_i32, %c0_i32_0 : i32, i32
  }
  func.func @transform_4(%arg0: i32) -> (i32, i32) {
    %c0_i32 = arith.constant 0 : i32
    %c0_i32_0 = arith.constant 0 : i32
    %c0_i32_1 = arith.constant 0 : i32
    return %c0_i32, %c0_i32_0 : i32, i32
  }
  func.func @transform_5(%arg0: i32) -> (i32, i32) {
    %c0_i32 = arith.constant 0 : i32
    %c0_i32_0 = arith.constant 0 : i32
    %c0_i32_1 = arith.constant 0 : i32
    return %c0_i32, %c0_i32_0 : i32, i32
  }
  func.func @transform_6(%arg0: i32) -> (i32, i32) {
    %c0_i32 = arith.constant 0 : i32
    %c0_i32_0 = arith.constant 0 : i32
    %c0_i32_1 = arith.constant 0 : i32
    return %c0_i32, %c0_i32_0 : i32, i32
  }
  func.func @transform_7(%arg0: i32) -> (i32, i32) {
    %c0_i32 = arith.constant 0 : i32
    %c0_i32_0 = arith.constant 0 : i32
    return %arg0, %c0_i32 : i32, i32
  }
}

</mosaic_0001>

<bundles_post_ra>
// kernel: tile.18
= control target key start
LH: loop header
LB: loop body
LE: loop exit
PB: predicated region body
PF: predicated region fallthrough
CT: control target
= control target key end

     0   :  { %s22_s0 = inlined_call_operand.vmem [shape: f32[64], index: 0, kind: input, shape index: {}]   ;;  %s23_s1 = inlined_call_operand.vmem [shape: f32[2,64], index: 1, kind: output, shape index: {}]  }
   0x1   :  { %v4_v0 = vld [vmem:[%s22_s0] ss:$0 sm:$0xff] }
   0x2   :  { %5 = vst [vmem:[%s23_s1] sm:$0x3] %v4_v0 }

// kernel: tile.19
= control target key start
LH: loop header
LB: loop body
LE: loop exit
PB: predicated region body
PF: predicated region fallthrough
CT: control target
= control target key end

     0   :  { %vm7_vm0 = vcmask 523264   ;;  %vm13_vm1 = vcmask 1048064   ;;  %s39_s0 = inlined_call_operand.vmem [shape: f32[2,64], index: 0, kind: input, shape index: {}]   ;;  %s40_s1 = inlined_call_operand.vmem [shape: f32[1,128], index: 1, kind: output, shape index: {}]  }
   0x1   :  { %v4_v0 = vld [vmem:[%s39_s0] sm:$0x3]  ;;  %s22_s0 = smov 64  }
   0x2   :  { %5 = vst [vmem:[#allocation1] sm:$0x3] %v4_v0 }
   0x9   :  { %v10_v1 = vld [vmem:[#allocation1 + $0x1] sm:$0x1]   ;;  %v6_v2 = vld [vmem:[#allocation1] sm:$0x1]  }
   0xa   :  { %11 = vrot.lane.b32.xlu0 %v10_v1, %s22_s0  ;;  %8 = vst.msk [vmem:[#allocation0] sm:$0x1] %vm7_vm0, %v6_v2  }
  0x7c   :  { %v12_v3 = vpop.permute.xlu0 %11  }
  0x7d   :  { %14 = vst.msk [vmem:[#allocation0] sm:$0x1] %vm13_vm1, %v12_v3  }
  0x84   :  { %v18_v4 = vld [vmem:[#allocation0] sm:$0x1] }
  0x85   :  { %20 = vst [vmem:[%s40_s1] sm:$0x1] %v18_v4 }

// kernel: tile.23
= control target key start
LH: loop header
LB: loop body
LE: loop exit
PB: predicated region body
PF: predicated region fallthrough
CT: control target
= control target key end

     0   :  { %s22_s0 = inlined_call_operand.vmem [shape: f32[128], index: 0, kind: input, shape index: {}]   ;;  %s23_s1 = inlined_call_operand.vmem [shape: f32[2,128], index: 1, kind: output, shape index: {}]  }
   0x1   :  { %v4_v0 = vld [vmem:[%s22_s0] ss:$0 sm:$0xff] }
   0x2   :  { %5 = vst [vmem:[%s23_s1] sm:$0x3] %v4_v0 }

// kernel: vitnet_forward.1
= control target key start
LH: loop header
LB: loop body
LE: loop exit
PB: predicated region body
PF: predicated region fallthrough
CT: control target
= control target key end

     0   :  { %vm182_vm0 = vcmask 588800   ;;  %vm231_vm1 = vcmask 1043456   ;;  %v2133_v38 = vmov 0   ;;  %s3318_s1 = inlined_call_operand.vmem [shape: bf16[72,128], index: 1, kind: input, shape index: {}]   ;;  %s3319_s0 = inlined_call_operand.vmem [shape: bf16[256,72], index: 0, kind: input, shape index: {}]   ;;  %s3320_s3 = inlined_call_operand.vmem [shape: bf16[128,256], index: 3, kind: input, shape index: {}]   ;;  %s3321_s2 = inlined_call_operand.vmem [shape: f32[1,128], index: 2, kind: input, shape index: {}]   ;;  %s3322_s5 = inlined_call_operand.vmem [shape: bf16[256,128], index: 5, kind: input, shape index: {}]   ;;  %s3323_s4 = inlined_call_operand.vmem [shape: f32[1,256], index: 4, kind: input, shape index: {}]   ;;  %s3324_s6 = inlined_call_operand.vmem [shape: f32[1,128], index: 6, kind: input, shape index: {}]   ;;  %s3325_s7 = inlined_call_operand.vmem [shape: f32[256,128], index: 7, kind: output, shape index: {}]  }
   0x1   :  { %v1944_v0 = vld [vmem:[%s3318_s1] sm:$0xff]   ;;  %v1945_v1 = vld [vmem:[%s3318_s1 + $0x8] sm:$0xff]   ;;  %v1946_v2 = vld [vmem:[%s3318_s1 + $0x10] sm:$0xff]  }
   0x2   :  { %1889 = vmatprep.subr.bf16.mxu0 %v1944_v0  ;;  %1931 = vmatprep.subr.bf16.mxu1 %v1944_v0  ;;  %v1949_v3 = vld [vmem:[%s3319_s0] sm:$0xff]   ;;  %v1947_v4 = vld [vmem:[%s3318_s1 + $0x18] sm:$0xff]   ;;  %v1950_v8 = vld [vmem:[%s3319_s0 + $0x8] sm:$0xff]  }
   0x3   :  { %1890 = vmatpush3.bf16.msra.mxu0 %v1944_v0  ;;  %1936 = vmatpush3.bf16.msra.mxu1 %v1944_v0  ;;  %v1948_v5 = vld [vmem:[%s3318_s1 + $0x20] ss:$0 sps:$4 sm:$0xff]   ;;  %v1951_v9 = vld [vmem:[%s3319_s0 + $0x10] sm:$0xff]   ;;  %v1958_v10 = vld [vmem:[%s3319_s0 + $0x48] sm:$0xff]  }
   0x4   :  { %1891 = vmatprep.subr.bf16.mxu0 %v1945_v1  ;;  %1932 = vmatprep.subr.bf16.mxu1 %v1945_v1  ;;  %v1957_v6 = vld [vmem:[%s3319_s0 + $0x40] sm:$0xff]   ;;  %v233_v7 = vsel %vm231_vm1, %v1948_v5, 0  ;;  %v1959_v11 = vld [vmem:[%s3319_s0 + $0x50] sm:$0xff]   ;;  %v1952_v15 = vld [vmem:[%s3319_s0 + $0x18] sm:$0xff]  }
   0x5   :  { %1899 = vmatprep.mubr.msk.bf16.mxu0 %vm182_vm0, %v1949_v3  ;;  %1915 = vmatprep.mubr.msk.bf16.mxu1 %vm182_vm0, %v1957_v6  ;;  %v1965_v12 = vld [vmem:[%s3320_s3] ss:$8 sps:$4 sm:$0xff]   ;;  %v1967_v13 = vld [vmem:[%s3320_s3 + $0x4] ss:$8 sps:$4 sm:$0xff]   ;;  %v1970_v14 = vld [vmem:[%s3320_s3 + $0x14] ss:$8 sps:$4 sm:$0xff]  }
   0x6   :  { %v1953_v16 = vld [vmem:[%s3319_s0 + $0x20] sm:$0xff]   ;;  %v1968_v17 = vld [vmem:[%s3320_s3 + $0x10] ss:$8 sps:$4 sm:$0xff]   ;;  %v1976_v22 = vld [vmem:[%s3320_s3 + $0x34] ss:$8 sps:$4 sm:$0xff]  }
   0x7   :  { %1892 = vmatpush3.bf16.msra.mxu0 %v1945_v1  ;;  %1937 = vmatpush3.bf16.msra.mxu1 %v1945_v1  ;;  %v1973_v18 = vld [vmem:[%s3320_s3 + $0x24] ss:$8 sps:$4 sm:$0xff]   ;;  %v1960_v19 = vld [vmem:[%s3319_s0 + $0x58] sm:$0xff]   ;;  %v1971_v21 = vld [vmem:[%s3320_s3 + $0x20] ss:$8 sps:$4 sm:$0xff]  }
   0x8   :  { %1893 = vmatprep.subr.bf16.mxu0 %v1946_v2  ;;  %1933 = vmatprep.subr.bf16.mxu1 %v1946_v2  ;;  %v1961_v20 = vld [vmem:[%s3319_s0 + $0x60] sm:$0xff]   ;;  %v1974_v23 = vld [vmem:[%s3320_s3 + $0x30] ss:$8 sps:$4 sm:$0xff]   ;;  %v1954_v24 = vld [vmem:[%s3319_s0 + $0x28] sm:$0xff]  }
   0x9   :  { %v1979_v25 = vld [vmem:[%s3320_s3 + $0x44] ss:$8 sps:$4 sm:$0xff]   ;;  %v1955_v26 = vld [vmem:[%s3319_s0 + $0x30] sm:$0xff]   ;;  %v1977_v29 = vld [vmem:[%s3320_s3 + $0x40] ss:$8 sps:$4 sm:$0xff]  }
   0xa   :  { %v1962_v27 = vld [vmem:[%s3319_s0 + $0x68] sm:$0xff]   ;;  %v1963_v28 = vld [vmem:[%s3319_s0 + $0x70] sm:$0xff]   ;;  %v1956_v32 = vld [vmem:[%s3319_s0 + $0x38] sm:$0xff]  }
   0xb   :  { %1894 = vmatpush3.bf16.msra.mxu0 %v1946_v2  ;;  %1938 = vmatpush3.bf16.msra.mxu1 %v1946_v2  ;;  %v1982_v30 = vld [vmem:[%s3320_s3 + $0x54] ss:$8 sps:$4 sm:$0xff]   ;;  %v1980_v31 = vld [vmem:[%s3320_s3 + $0x50] ss:$8 sps:$4 sm:$0xff]   ;;  %v1985_v34 = vld [vmem:[%s3320_s3 + $0x64] ss:$8 sps:$4 sm:$0xff]  }
   0xc   :  { %1895 = vmatprep.subr.bf16.mxu0 %v1947_v4  ;;  %1934 = vmatprep.subr.bf16.mxu1 %v1947_v4  ;;  %v1964_v33 = vld [vmem:[%s3319_s0 + $0x78] sm:$0xff]   ;;  %v1983_v35 = vld [vmem:[%s3320_s3 + $0x60] ss:$8 sps:$4 sm:$0xff]  }
   0xd   :  { %v1988_v36 = vld [vmem:[%s3320_s3 + $0x74] ss:$8 sps:$4 sm:$0xff]   ;;  %v1986_v37 = vld [vmem:[%s3320_s3 + $0x70] ss:$8 sps:$4 sm:$0xff]   ;;  %v2305_v39 = vld [vmem:[%s3321_s2] ss:$0 sm:$0xff] }
   0xf   :  { %1896 = vmatpush3.bf16.msra.mxu0 %v1947_v4  ;;  %1939 = vmatpush3.bf16.msra.mxu1 %v1947_v4 }
  0x10   :  { %1941 = vmatprep.subr.msk.bf16.mxu0 %vm231_vm1, %v1948_v5  ;;  %1942 = vmatprep.subr.msk.bf16.mxu1 %vm231_vm1, %v1948_v5 }
  0x13   :  { %1898 = vmatpush3.bf16.msra.mxu0 %v233_v7  ;;  %1940 = vmatpush3.bf16.msra.mxu1 %v233_v7 }
  0x14   :  { %552 = vmatprep.subr.bf16.mxu1 %v1967_v13 }
  0x16   :  { %1900 = vmatmul.mubr.msk.bf16.vlgmr.msra.gmra.mrb[0].mxu0 %vm182_vm0, %v1950_v8  ;;  %1916 = vmatmul.mubr.msk.bf16.vlgmr.msra.gmra.mrb[0].mxu1 %vm182_vm0, %v1958_v10 }
  0x17   :  { %1903 = vmatprep.mubr.msk.bf16.mxu0 %vm182_vm0, %v1951_v9  ;;  %1919 = vmatprep.mubr.msk.bf16.mxu1 %vm182_vm0, %v1959_v11 }
  0x18   :  { %553 = vmatpush1.bf16.msra.mxu1 %v1965_v12 }
  0x19   :  { %554 = vmatprep.subr.bf16.mxu1 %v1970_v14 }
  0x1c   :  { %555 = vmatpush1.bf16.msra.mxu1 %v1968_v17 }
  0x1d   :  { %556 = vmatprep.subr.bf16.mxu1 %v1973_v18 }
  0x1e   :  { %1904 = vmatmul.mubr.msk.bf16.gmra.mrb[4].mxu0 %vm182_vm0, %v1952_v15  ;;  %1920 = vmatmul.mubr.msk.bf16.gmra.mrb[4].mxu1 %vm182_vm0, %v1960_v19 }
  0x1f   :  { %1907 = vmatprep.mubr.msk.bf16.mxu0 %vm182_vm0, %v1953_v16  ;;  %1923 = vmatprep.mubr.msk.bf16.mxu1 %vm182_vm0, %v1961_v20 }
  0x20   :  { %557 = vmatpush1.bf16.msra.mxu1 %v1971_v21 }
  0x21   :  { %558 = vmatprep.subr.bf16.mxu1 %v1976_v22 }
  0x24   :  { %559 = vmatpush1.bf16.msra.mxu1 %v1974_v23 }
  0x25   :  { %560 = vmatprep.subr.bf16.mxu1 %v1979_v25 }
  0x26   :  { %1908 = vmatmul.mubr.msk.bf16.gmra.mrb[8].mxu0 %vm182_vm0, %v1954_v24  ;;  %1924 = vmatmul.mubr.msk.bf16.gmra.mrb[8].mxu1 %vm182_vm0, %v1962_v27 }
  0x27   :  { %1911 = vmatprep.mubr.msk.bf16.mxu0 %vm182_vm0, %v1955_v26  ;;  %1927 = vmatprep.mubr.msk.bf16.mxu1 %vm182_vm0, %v1963_v28 }
  0x28   :  { %561 = vmatpush1.bf16.msra.mxu1 %v1977_v29 }
  0x29   :  { %562 = vmatprep.subr.bf16.mxu1 %v1982_v30 }
  0x2c   :  { %563 = vmatpush1.bf16.msra.mxu1 %v1980_v31 }
  0x2d   :  { %564 = vmatprep.subr.bf16.mxu1 %v1985_v34 }
  0x2e   :  { %1912 = vmatmul.mubr.msk.bf16.gmra.mrb[12].mxu0 %vm182_vm0, %v1956_v32  ;;  %1928 = vmatmul.mubr.msk.bf16.gmra.mrb[12].mxu1 %vm182_vm0, %v1964_v33 }
  0x2f   :  { %584 = vmatprep.mubr.bf16.mxu1 %v2133_v38 }
  0x30   :  { %565 = vmatpush1.bf16.msra.mxu1 %v1983_v35 }
  0x31   :  { %566 = vmatprep.subr.bf16.mxu1 %v1988_v36 }
  0x34   :  { %567 = vmatpush1.bf16.msra.mxu1 %v1986_v37 }
  0xe9   :  { %v1901_v40 = vpop.f32.mrb[0].mxu0  ;;  %v1917_v43 = vpop.f32.mrb[0].mxu1 }
  0xea   :  { %v278_v41 = vadd.f32 %v1901_v40, %v2305_v39  ;;  %v269_v42 = vpop.f32.mrb[1].mxu0  ;;  %v342_v46 = vadd.f32 %v1917_v43, %v2305_v39  ;;  %v333_v47 = vpop.f32.mrb[1].mxu1 }
  0xeb   :  { %v270_v44 = vadd.f32 %v2305_v39, %v269_v42  ;;  %v1902_v45 = vpop.f32.mrb[2].mxu0  ;;  %v334_v50 = vadd.f32 %v2305_v39, %v333_v47  ;;  %v1918_v51 = vpop.f32.mrb[2].mxu1 }
  0xec   :  { %v281_v48 = vadd.f32 %v1902_v45, %v2305_v39  ;;  %v272_v49 = vpop.f32.mrb[3].mxu0  ;;  %v414_v53 = vmax.f32 %v342_v46, 0.0  ;;  %v345_v54 = vadd.f32 %v1918_v51, %v2305_v39  ;;  %v336_v55 = vpop.f32.mrb[3].mxu1  ;;  %v398_v56 = vmax.f32 %v278_v41, 0.0 }
  0xed   :  { %v273_v52 = vadd.f32 %v2305_v39, %v272_v49  ;;  %v412_v58 = vmax.f32 %v334_v50, 0.0  ;;  %v337_v59 = vadd.f32 %v2305_v39, %v336_v55  ;;  %v396_v60 = vmax.f32 %v270_v44, 0.0 }
  0xee   :  { %v399_v57 = vmax.f32 %v281_v48, 0.0  ;;  %v415_v62 = vmax.f32 %v345_v54, 0.0 }
  0xef   :  { %v397_v61 = vmax.f32 %v273_v52, 0.0  ;;  %v413_v0 = vmax.f32 %v337_v59, 0.0 }
  0xf0   :  { %v429_v63 = vpack.c.bf16 %v399_v57, %v398_v56  ;;  %v2315_v3 = vpack.c.bf16 %v415_v62, %v414_v53 }
  0xf1   :  { %v428_v1 = vpack.c.bf16 %v397_v61, %v396_v60  ;;  %v1905_v2 = vpop.f32.mrb[4].mxu0  ;;  %v2318_v6 = vpack.c.bf16 %v413_v0, %v412_v58  ;;  %v1921_v7 = vpop.f32.mrb[4].mxu1 }
  0xf2   :  { %v294_v4 = vadd.f32 %v1905_v2, %v2305_v39  ;;  %v285_v5 = vpop.f32.mrb[5].mxu0  ;;  %v358_v10 = vadd.f32 %v1921_v7, %v2305_v39  ;;  %v349_v11 = vpop.f32.mrb[5].mxu1 }
  0xf3   :  { %585 = vmatmul.mubr.bf16.vlgmr.msra.gmra.mrb[16].mxu1 %v428_v1  ;;  %v286_v8 = vadd.f32 %v2305_v39, %v285_v5  ;;  %v1906_v9 = vpop.f32.mrb[6].mxu0  ;;  %v350_v15 = vadd.f32 %v2305_v39, %v349_v11  ;;  %v1922_v16 = vpop.f32.mrb[6].mxu1 }
  0xf4   :  { %v402_v12 = vmax.f32 %v294_v4, 0.0  ;;  %v297_v13 = vadd.f32 %v1906_v9, %v2305_v39  ;;  %v288_v14 = vpop.f32.mrb[7].mxu0  ;;  %594 = vmatprep.mubr.bf16.mxu1 %v2133_v38  ;;  %v418_v19 = vmax.f32 %v358_v10, 0.0  ;;  %v361_v20 = vadd.f32 %v1922_v16, %v2305_v39  ;;  %v352_v21 = vpop.f32.mrb[7].mxu1 }
  0xf5   :  { %v400_v17 = vmax.f32 %v286_v8, 0.0  ;;  %v289_v18 = vadd.f32 %v2305_v39, %v288_v14  ;;  %v416_v23 = vmax.f32 %v350_v15, 0.0  ;;  %v353_v24 = vadd.f32 %v2305_v39, %v352_v21 }
  0xf6   :  { %v403_v22 = vmax.f32 %v297_v13, 0.0  ;;  %v419_v26 = vmax.f32 %v361_v20, 0.0 }
  0xf7   :  { %v401_v25 = vmax.f32 %v289_v18, 0.0  ;;  %v417_v28 = vmax.f32 %v353_v24, 0.0 }
  0xf8   :  { %v2328_v27 = vpack.c.bf16 %v403_v22, %v402_v12  ;;  %v2330_v31 = vpack.c.bf16 %v419_v26, %v418_v19 }
  0xf9   :  { %v430_v29 = vpack.c.bf16 %v401_v25, %v400_v17  ;;  %v1909_v30 = vpop.f32.mrb[8].mxu0  ;;  %v2333_v34 = vpack.c.bf16 %v417_v28, %v416_v23  ;;  %v1925_v35 = vpop.f32.mrb[8].mxu1 }
  0xfa   :  { %v310_v32 = vadd.f32 %v1909_v30, %v2305_v39  ;;  %v301_v33 = vpop.f32.mrb[9].mxu0  ;;  %v374_v40 = vadd.f32 %v1925_v35, %v2305_v39  ;;  %v365_v41 = vpop.f32.mrb[9].mxu1  ;;  %v1994_v30 = vld [vmem:[%s3322_s5 + $0x10] sm:$0xff]   ;;  %v1999_v35 = vld [vmem:[%s3322_s5 + $0x68] sm:$0xff]  }
  0xfb   :  { %595 = vmatmul.mubr.bf16.gmra.mrb[20].mxu1 %v429_v63  ;;  %v302_v36 = vadd.f32 %v2305_v39, %v301_v33  ;;  %v1910_v37 = vpop.f32.mrb[10].mxu0  ;;  %v366_v45 = vadd.f32 %v2305_v39, %v365_v41  ;;  %v1926_v46 = vpop.f32.mrb[10].mxu1  ;;  %v1997_v33 = vld [vmem:[%s3322_s5 + $0x60] sm:$0xff]   ;;  %v2003_v41 = vld [vmem:[%s3322_s5 + $0x78] sm:$0xff]  }
  0xfc   :  { %604 = vmatprep.mubr.bf16.mxu1 %v2133_v38  ;;  %v406_v42 = vmax.f32 %v310_v32, 0.0  ;;  %v313_v43 = vadd.f32 %v1910_v37, %v2305_v39  ;;  %v304_v44 = vpop.f32.mrb[11].mxu0  ;;  %v422_v49 = vmax.f32 %v374_v40, 0.0  ;;  %v377_v50 = vadd.f32 %v1926_v46, %v2305_v39  ;;  %v368_v51 = vpop.f32.mrb[11].mxu1  ;;  %v1996_v32 = vld [vmem:[%s3322_s5 + $0x18] sm:$0xff]   ;;  %v2001_v37 = vld [vmem:[%s3322_s5 + $0x70] sm:$0xff]  }
  0xfd   :  { %v404_v47 = vmax.f32 %v302_v36, 0.0  ;;  %v305_v48 = vadd.f32 %v2305_v39, %v304_v44  ;;  %v420_v53 = vmax.f32 %v366_v45, 0.0  ;;  %v369_v54 = vadd.f32 %v2305_v39, %v368_v51  ;;  %v2000_v36 = vld [vmem:[%s3322_s5 + $0x28] sm:$0xff]   ;;  %v2002_v40 = vld [vmem:[%s3322_s5 + $0x30] sm:$0xff]   ;;  %v460_v45 = vld [vmem:[%s3323_s4] sm:$0x3] }
  0xfe   :  { %v407_v52 = vmax.f32 %v313_v43, 0.0  ;;  %v423_v56 = vmax.f32 %v377_v50, 0.0  ;;  %v462_v43 = vlaneseq }
  0xff   :  { %v405_v55 = vmax.f32 %v305_v48, 0.0  ;;  %v421_v58 = vmax.f32 %v369_v54, 0.0 }
 0x100   :  { %v433_v57 = vpack.c.bf16 %v407_v52, %v406_v42  ;;  %v2343_v61 = vpack.c.bf16 %v423_v56, %v422_v49  ;;  %v2004_v42 = vld [vmem:[%s3322_s5 + $0x38] sm:$0xff]   ;;  %v463_v44 = vshrl.u32 %v462_v43, 7 }
 0x101   :  { %v432_v59 = vpack.c.bf16 %v405_v55, %v404_v47  ;;  %v1913_v60 = vpop.f32.mrb[12].mxu0  ;;  %v440_v0 = vpack.c.bf16 %v421_v58, %v420_v53  ;;  %v1929_v1 = vpop.f32.mrb[12].mxu1 }
 0x102   :  { %v326_v62 = vadd.f32 %v1913_v60, %v2305_v39  ;;  %v317_v63 = vpop.f32.mrb[13].mxu0  ;;  %v390_v5 = vadd.f32 %v1929_v1, %v2305_v39  ;;  %v381_v7 = vpop.f32.mrb[13].mxu1  ;;  %v468_v46 = vsub.s32 1, %v463_v44 }
 0x103   :  { %605 = vmatmul.mubr.bf16.gmra.mrb[24].mxu1 %v430_v29  ;;  %v318_v2 = vadd.f32 %v2305_v39, %v317_v63  ;;  %v1914_v4 = vpop.f32.mrb[14].mxu0  ;;  %v382_v11 = vadd.f32 %v2305_v39, %v381_v7  ;;  %v1930_v12 = vpop.f32.mrb[14].mxu1  ;;  %v1993_v29 = vld [vmem:[%s3322_s5 + $0x50] sm:$0xff]  }
 0x104   :  { %614 = vmatprep.mubr.bf16.mxu1 %v2133_v38  ;;  %v410_v8 = vmax.f32 %v326_v62, 0.0  ;;  %v329_v9 = vadd.f32 %v1914_v4, %v2305_v39  ;;  %v320_v10 = vpop.f32.mrb[15].mxu0  ;;  %v426_v15 = vmax.f32 %v390_v5, 0.0  ;;  %v393_v16 = vadd.f32 %v1930_v12, %v2305_v39  ;;  %v384_v17 = vpop.f32.mrb[15].mxu1 }
 0x105   :  { %v408_v13 = vmax.f32 %v318_v2, 0.0  ;;  %v321_v14 = vadd.f32 %v2305_v39, %v320_v10  ;;  %v424_v19 = vmax.f32 %v382_v11, 0.0  ;;  %v385_v20 = vadd.f32 %v2305_v39, %v384_v17  ;;  %v1989_v39 = vld [vmem:[%s3322_s5 + $0x40] sm:$0xff]  }
 0x106   :  { %v411_v18 = vmax.f32 %v329_v9, 0.0  ;;  %v427_v22 = vmax.f32 %v393_v16, 0.0  ;;  %1777 = vmatprep.subr.bf16.mxu0 %v1989_v39  ;;  %v2425_v48 = vrot.slane %v460_v45, %v468_v46 }
 0x107   :  { %v409_v21 = vmax.f32 %v321_v14, 0.0  ;;  %v425_v24 = vmax.f32 %v385_v20, 0.0 }
 0x108   :  { %v435_v23 = vpack.c.bf16 %v411_v18, %v410_v8  ;;  %v443_v26 = vpack.c.bf16 %v427_v22, %v426_v15 }
 0x109   :  { %v434_v25 = vpack.c.bf16 %v409_v21, %v408_v13  ;;  %v442_v28 = vpack.c.bf16 %v425_v24, %v424_v19 }
 0x10b   :  { %615 = vmatmul.mubr.bf16.gmra.mrb[28].mxu1 %v2328_v27  ;;  %v1990_v27 = vld [vmem:[%s3322_s5] sm:$0xff]  }
 0x10c   :  { %624 = vmatprep.mubr.bf16.mxu1 %v2133_v38  ;;  %1778 = vmatpush3.bf16.msra.mxu0 %v1990_v27 }
 0x113   :  { %625 = vmatmul.mubr.bf16.gmra.mrb[32].mxu1 %v432_v59 }
 0x114   :  { %634 = vmatprep.mubr.bf16.mxu1 %v2133_v38 }
 0x11b   :  { %635 = vmatmul.mubr.bf16.gmra.mrb[36].mxu1 %v433_v57 }
 0x11c   :  { %644 = vmatprep.mubr.bf16.mxu1 %v2133_v38 }
 0x123   :  { %645 = vmatmul.mubr.bf16.gmra.mrb[40].mxu1 %v434_v25 }
 0x124   :  { %654 = vmatprep.mubr.bf16.mxu1 %v2133_v38 }
 0x12b   :  { %655 = vmatmul.mubr.bf16.gmra.mrb[44].mxu1 %v435_v23 }
 0x12c   :  { %664 = vmatprep.mubr.bf16.mxu1 %v2133_v38 }
 0x133   :  { %665 = vmatmul.mubr.bf16.gmra.mrb[48].mxu1 %v2318_v6  ;;  %v1992_v6 = vld [vmem:[%s3322_s5 + $0x8] sm:$0xff]  }
 0x134   :  { %674 = vmatprep.mubr.bf16.mxu1 %v2133_v38 }
 0x13b   :  { %675 = vmatmul.mubr.bf16.gmra.mrb[52].mxu1 %v2315_v3  ;;  %v1991_v3 = vld [vmem:[%s3322_s5 + $0x48] sm:$0xff]  }
 0x13c   :  { %684 = vmatprep.mubr.bf16.mxu1 %v2133_v38  ;;  %1779 = vmatprep.subr.bf16.mxu0 %v1991_v3 }
 0x13d   :  { %1780 = vmatpush3.bf16.msra.mxu0 %v1992_v6 }
 0x13e   :  { %1781 = vmatprep.subr.bf16.mxu0 %v1993_v29 }
 0x141   :  { %1782 = vmatpush3.bf16.msra.mxu0 %v1994_v30 }
 0x143   :  { %685 = vmatmul.mubr.bf16.gmra.mrb[56].mxu1 %v2333_v34  ;;  %v1998_v34 = vld [vmem:[%s3322_s5 + $0x20] sm:$0xff]  }
 0x144   :  { %694 = vmatprep.mubr.bf16.mxu1 %v2133_v38 }
 0x14b   :  { %695 = vmatmul.mubr.bf16.gmra.mrb[60].mxu1 %v2330_v31  ;;  %v1995_v31 = vld [vmem:[%s3322_s5 + $0x58] sm:$0xff]  }
 0x14c   :  { %704 = vmatprep.mubr.bf16.mxu1 %v2133_v38  ;;  %1783 = vmatprep.subr.bf16.mxu0 %v1995_v31 }
 0x14d   :  { %1784 = vmatpush3.bf16.msra.mxu0 %v1996_v32 }
 0x14e   :  { %1785 = vmatprep.subr.bf16.mxu0 %v1997_v33 }
 0x151   :  { %1786 = vmatpush3.bf16.msra.mxu0 %v1998_v34 }
 0x152   :  { %1787 = vmatprep.subr.bf16.mxu0 %v1999_v35 }
 0x153   :  { %705 = vmatmul.mubr.bf16.gmra.mrb[64].mxu1 %v440_v0 }
 0x154   :  { %714 = vmatprep.mubr.bf16.mxu1 %v2133_v38 }
 0x155   :  { %1788 = vmatpush3.bf16.msra.mxu0 %v2000_v36 }
 0x156   :  { %1789 = vmatprep.subr.bf16.mxu0 %v2001_v37 }
 0x159   :  { %1790 = vmatpush3.bf16.msra.mxu0 %v2002_v40 }
 0x15a   :  { %1791 = vmatprep.subr.bf16.mxu0 %v2003_v41 }
 0x15b   :  { %715 = vmatmul.mubr.bf16.gmra.mrb[68].mxu1 %v2343_v61 }
 0x15c   :  { %724 = vmatprep.mubr.bf16.mxu1 %v2133_v38 }
 0x15d   :  { %1792 = vmatpush3.bf16.msra.mxu0 %v2004_v42 }
 0x163   :  { %725 = vmatmul.mubr.bf16.gmra.mrb[72].mxu1 %v442_v28 }
 0x164   :  { %734 = vmatprep.mubr.bf16.mxu1 %v2133_v38  ;;  %v464_v38 = vsub.s32 0, %v463_v44 }
 0x166   :  { %v2423_v47 = vrot.slane %v460_v45, %v464_v38 }
 0x16b   :  { %735 = vmatmul.mubr.bf16.gmra.mrb[76].mxu1 %v443_v26 }
 0x1c6   :  { %v586_v49 = vpop.f32.mrb[16].mxu1 }
 0x1c7   :  { %v2428_v50 = vadd.f32 %v586_v49, %v2423_v47  ;;  %v588_v51 = vpop.f32.mrb[17].mxu1 }
 0x1c8   :  { %v2431_v52 = vadd.f32 %v588_v51, %v2425_v48  ;;  %v590_v53 = vpop.f32.mrb[18].mxu1 }
 0x1c9   :  { %v745_v54 = vmul.f32 %v2428_v50, %v2428_v50  ;;  %v2436_v55 = vadd.f32 %v590_v53, %v2423_v47  ;;  %v592_v56 = vpop.f32.mrb[19].mxu1 }
 0x1ca   :  { %v746_v57 = vmul.f32 %v2431_v52, %v2431_v52  ;;  %v2441_v58 = vadd.f32 %v592_v56, %v2425_v48 }
 0x1cb   :  { %v809_v59 = vmul.f32 %v745_v54, %v2428_v50  ;;  %v747_v60 = vmul.f32 %v2436_v55, %v2436_v55 }
 0x1cc   :  { %v810_v61 = vmul.f32 %v746_v57, %v2431_v52  ;;  %v748_v62 = vmul.f32 %v2441_v58, %v2441_v58 }
 0x1cd   :  { %v873_v63 = vmul.f32 0.044715, %v809_v59  ;;  %v811_v0 = vmul.f32 %v747_v60, %v2436_v55 }
 0x1ce   :  { %v874_v1 = vmul.f32 0.044715, %v810_v61  ;;  %v812_v2 = vmul.f32 %v748_v62, %v2441_v58  ;;  %v596_v4 = vpop.f32.mrb[20].mxu1 }
 0x1cf   :  { %v937_v5 = vadd.f32 %v873_v63, %v2428_v50  ;;  %v875_v7 = vmul.f32 0.044715, %v811_v0  ;;  %v2453_v8 = vadd.f32 %v596_v4, %v2423_v47  ;;  %v598_v9 = vpop.f32.mrb[21].mxu1 }
 0x1d0   :  { %v938_v10 = vadd.f32 %v874_v1, %v2431_v52  ;;  %v876_v11 = vmul.f32 0.044715, %v812_v2  ;;  %v2457_v12 = vadd.f32 %v598_v9, %v2425_v48  ;;  %v600_v13 = vpop.f32.mrb[22].mxu1 }
 0x1d1   :  { %v1001_v14 = vmul.f32 0.7978846, %v937_v5  ;;  %v939_v15 = vadd.f32 %v875_v7, %v2436_v55  ;;  %v749_v16 = vmul.f32 %v2453_v8, %v2453_v8  ;;  %v2463_v17 = vadd.f32 %v600_v13, %v2423_v47  ;;  %v602_v18 = vpop.f32.mrb[23].mxu1 }
 0x1d2   :  { %v1002_v19 = vmul.f32 0.7978846, %v938_v10  ;;  %v940_v20 = vadd.f32 %v876_v11, %v2441_v58  ;;  %v750_v21 = vmul.f32 %v2457_v12, %v2457_v12  ;;  %v2469_v22 = vadd.f32 %v602_v18, %v2425_v48 }
 0x1d3   :  { %2005 = vtanh.f32 %v1001_v14  ;;  %v1003_v23 = vmul.f32 0.7978846, %v939_v15  ;;  %v813_v24 = vmul.f32 %v749_v16, %v2453_v8  ;;  %v751_v25 = vmul.f32 %v2463_v17, %v2463_v17 }
 0x1d4   :  { %2007 = vtanh.f32 %v1002_v19  ;;  %v1004_v26 = vmul.f32 0.7978846, %v940_v20  ;;  %v814_v28 = vmul.f32 %v750_v21, %v2457_v12  ;;  %v752_v39 = vmul.f32 %v2469_v22, %v2469_v22 }
 0x1d5   :  { %2009 = vtanh.f32 %v1003_v23  ;;  %v877_v27 = vmul.f32 0.044715, %v813_v24  ;;  %v815_v3 = vmul.f32 %v751_v25, %v2463_v17 }
 0x1d6   :  { %v878_v6 = vmul.f32 0.044715, %v814_v28  ;;  %v816_v29 = vmul.f32 %v752_v39, %v2469_v22  ;;  %v606_v30 = vpop.f32.mrb[24].mxu1  ;;  %2011 = vtanh.f32 %v1004_v26 }
 0x1d7   :  { %v941_v31 = vadd.f32 %v877_v27, %v2453_v8  ;;  %v879_v32 = vmul.f32 0.044715, %v815_v3  ;;  %v2481_v33 = vadd.f32 %v606_v30, %v2423_v47  ;;  %v608_v34 = vpop.f32.mrb[25].mxu1 }
 0x1d8   :  { %v942_v35 = vadd.f32 %v878_v6, %v2457_v12  ;;  %v880_v36 = vmul.f32 0.044715, %v816_v29  ;;  %v2485_v37 = vadd.f32 %v608_v34, %v2425_v48  ;;  %v610_v40 = vpop.f32.mrb[26].mxu1 }
 0x1d9   :  { %v1005_v41 = vmul.f32 0.7978846, %v941_v31  ;;  %v943_v42 = vadd.f32 %v879_v32, %v2463_v17  ;;  %v753_v43 = vmul.f32 %v2481_v33, %v2481_v33  ;;  %v2491_v44 = vadd.f32 %v610_v40, %v2423_v47  ;;  %v612_v38 = vpop.f32.mrb[27].mxu1 }
 0x1da   :  { %v1006_v45 = vmul.f32 0.7978846, %v942_v35  ;;  %v944_v46 = vadd.f32 %v880_v36, %v2469_v22  ;;  %v754_v49 = vmul.f32 %v2485_v37, %v2485_v37  ;;  %v2497_v51 = vadd.f32 %v612_v38, %v2425_v48 }
 0x1db   :  { %2013 = vtanh.f32 %v1005_v41  ;;  %v1007_v53 = vmul.f32 0.7978846, %v943_v42  ;;  %v817_v54 = vmul.f32 %v753_v43, %v2481_v33  ;;  %v755_v56 = vmul.f32 %v2491_v44, %v2491_v44 }
 0x1dc   :  { %2015 = vtanh.f32 %v1006_v45  ;;  %v1008_v57 = vmul.f32 0.7978846, %v944_v46  ;;  %v818_v59 = vmul.f32 %v754_v49, %v2485_v37  ;;  %v756_v60 = vmul.f32 %v2497_v51, %v2497_v51 }
 0x1dd   :  { %v2006_v61 = vpop.eup %2005  ;;  %2017 = vtanh.f32 %v1007_v53  ;;  %v881_v62 = vmul.f32 0.044715, %v817_v54  ;;  %v819_v63 = vmul.f32 %v755_v56, %v2491_v44 }
 0x1de   :  { %v2008_v0 = vpop.eup %2007  ;;  %v1129_v1 = vadd.f32 1.0, %v2006_v61  ;;  %2019 = vtanh.f32 %v1008_v57  ;;  %v882_v2 = vmul.f32 0.044715, %v818_v59  ;;  %v820_v4 = vmul.f32 %v756_v60, %v2497_v51  ;;  %v616_v5 = vpop.f32.mrb[28].mxu1 }
 0x1df   :  { %v2010_v7 = vpop.eup %2009  ;;  %v945_v9 = vadd.f32 %v881_v62, %v2481_v33  ;;  %v883_v10 = vmul.f32 0.044715, %v819_v63  ;;  %v2509_v11 = vadd.f32 %v616_v5, %v2423_v47  ;;  %v618_v13 = vpop.f32.mrb[29].mxu1  ;;  %v1130_v14 = vadd.f32 1.0, %v2008_v0 }
 0x1e0   :  { %v1193_v15 = vmul.f32 0.5, %v1129_v1  ;;  %v1131_v16 = vadd.f32 1.0, %v2010_v7  ;;  %v946_v18 = vadd.f32 %v882_v2, %v2485_v37  ;;  %v884_v19 = vmul.f32 0.044715, %v820_v4  ;;  %v620_v20 = vpop.f32.mrb[30].mxu1  ;;  %v2012_v28 = vpop.eup %2011 }
 0x1e1   :  { %v1009_v21 = vmul.f32 0.7978846, %v945_v9  ;;  %v947_v23 = vadd.f32 %v883_v10, %v2491_v44  ;;  %v757_v24 = vmul.f32 %v2509_v11, %v2509_v11  ;;  %v2516_v25 = vadd.f32 %v618_v13, %v2425_v48  ;;  %v622_v26 = vpop.f32.mrb[31].mxu1 }
 0x1e2   :  { %v2519_v39 = vmul.f32 %v1193_v15, %v2428_v50  ;;  %v1195_v27 = vmul.f32 0.5, %v1131_v16  ;;  %v1010_v3 = vmul.f32 0.7978846, %v946_v18  ;;  %v948_v6 = vadd.f32 %v884_v19, %v2497_v51 }
 0x1e3   :  { %2021 = vtanh.f32 %v1009_v21  ;;  %v1011_v29 = vmul.f32 0.7978846, %v947_v23  ;;  %v821_v30 = vmul.f32 %v757_v24, %v2509_v11  ;;  %v758_v31 = vmul.f32 %v2516_v25, %v2516_v25 }
 0x1e4   :  { %v2526_v32 = vmul.f32 %v1195_v27, %v2436_v55  ;;  %2023 = vtanh.f32 %v1010_v3  ;;  %v1012_v34 = vmul.f32 0.7978846, %v948_v6  ;;  %v2529_v35 = vadd.f32 %v620_v20, %v2423_v47 }
 0x1e5   :  { %v2531_v50 = vpop.eup %2013  ;;  %2025 = vtanh.f32 %v1011_v29  ;;  %v885_v36 = vmul.f32 0.044715, %v821_v30  ;;  %v822_v40 = vmul.f32 %v758_v31, %v2516_v25  ;;  %v2535_v41 = vadd.f32 %v622_v26, %v2425_v48 }
 0x1e6   :  { %v2537_v42 = vpop.eup %2015  ;;  %v1321_v55 = vpack.c.bf16 %v2526_v32, %v2519_v39  ;;  %2027 = vtanh.f32 %v1012_v34  ;;  %v759_v43 = vmul.f32 %v2529_v35, %v2529_v35  ;;  %v626_v38 = vpop.f32.mrb[32].mxu1  ;;  %v1132_v45 = vadd.f32 1.0, %v2012_v28 }
 0x1e7   :  { %v2543_v46 = vpop.eup %2017  ;;  %v949_v49 = vadd.f32 %v885_v36, %v2509_v11  ;;  %v886_v53 = vmul.f32 0.044715, %v822_v40  ;;  %v760_v54 = vmul.f32 %v2535_v41, %v2535_v41  ;;  %v2549_v56 = vadd.f32 %v626_v38, %v2423_v47  ;;  %v628_v57 = vpop.f32.mrb[33].mxu1 }
 0x1e8   :  { %v2551_v59 = vpop.eup %2019  ;;  %v823_v60 = vmul.f32 %v759_v43, %v2529_v35  ;;  %v2555_v61 = vadd.f32 %v628_v57, %v2425_v48  ;;  %v630_v62 = vpop.f32.mrb[34].mxu1  ;;  %v1194_v63 = vmul.f32 0.5, %v1130_v14  ;;  %v1196_v0 = vmul.f32 0.5, %v1132_v45 }
 0x1e9   :  { %v1013_v1 = vmul.f32 0.7978846, %v949_v49  ;;  %v950_v2 = vadd.f32 %v886_v53, %v2516_v25  ;;  %v824_v4 = vmul.f32 %v760_v54, %v2535_v41  ;;  %v761_v5 = vmul.f32 %v2549_v56, %v2549_v56  ;;  %v632_v7 = vpop.f32.mrb[35].mxu1 }
 0x1ea   :  { %v887_v9 = vmul.f32 0.044715, %v823_v60  ;;  %v762_v10 = vmul.f32 %v2555_v61, %v2555_v61  ;;  %v2564_v13 = vadd.f32 %v630_v62, %v2423_v47  ;;  %v2567_v15 = vadd.f32 %v632_v7, %v2425_v48 }
 0x1eb   :  { %2029 = vtanh.f32 %v1013_v1  ;;  %v1014_v14 = vmul.f32 0.7978846, %v950_v2  ;;  %v888_v16 = vmul.f32 0.044715, %v824_v4  ;;  %v825_v18 = vmul.f32 %v761_v5, %v2549_v56 }
 0x1ec   :  { %v951_v19 = vadd.f32 %v887_v9, %v2529_v35  ;;  %v826_v20 = vmul.f32 %v762_v10, %v2555_v61  ;;  %v763_v21 = vmul.f32 %v2564_v13, %v2564_v13  ;;  %v764_v23 = vmul.f32 %v2567_v15, %v2567_v15 }
 0x1ed   :  { %v2576_v24 = vpop.eup %2021  ;;  %2031 = vtanh.f32 %v1014_v14  ;;  %v952_v26 = vadd.f32 %v888_v16, %v2535_v41  ;;  %v889_v28 = vmul.f32 0.044715, %v825_v18  ;;  %v1258_v27 = vmul.f32 %v1194_v63, %v2431_v52 }
 0x1ee   :  { %v2580_v3 = vpop.eup %2023  ;;  %v1015_v6 = vmul.f32 0.7978846, %v951_v19  ;;  %v890_v29 = vmul.f32 0.044715, %v826_v20  ;;  %v827_v30 = vmul.f32 %v763_v21, %v2564_v13  ;;  %v828_v31 = vmul.f32 %v764_v23, %v2567_v15  ;;  %v636_v34 = vpop.f32.mrb[36].mxu1 }
 0x1ef   :  { %v2584_v36 = vpop.eup %2025  ;;  %v1016_v40 = vmul.f32 0.7978846, %v952_v26  ;;  %v953_v43 = vadd.f32 %v889_v28, %v2549_v56  ;;  %v1260_v38 = vmul.f32 %v1196_v0, %v2441_v58  ;;  %v2589_v45 = vadd.f32 %v636_v34, %v2423_v47  ;;  %v638_v52 = vpop.f32.mrb[37].mxu1 }
 0x1f0   :  { %v2591_v49 = vpop.eup %2027  ;;  %2033 = vtanh.f32 %v1015_v6  ;;  %v954_v53 = vadd.f32 %v890_v29, %v2555_v61  ;;  %v891_v54 = vmul.f32 0.044715, %v827_v30  ;;  %v892_v57 = vmul.f32 0.044715, %v828_v31  ;;  %v640_v60 = vpop.f32.mrb[38].mxu1 }
 0x1f1   :  { %2035 = vtanh.f32 %v1016_v40  ;;  %v1017_v62 = vmul.f32 0.7978846, %v953_v43  ;;  %v1322_v63 = vpack.c.bf16 %v1260_v38, %v1258_v27  ;;  %v765_v1 = vmul.f32 %v2589_v45, %v2589_v45  ;;  %v642_v2 = vpop.f32.mrb[39].mxu1 }
 0x1f2   :  { %v1018_v58 = vmul.f32 0.7978846, %v954_v53  ;;  %v955_v0 = vadd.f32 %v891_v54, %v2564_v13  ;;  %v956_v4 = vadd.f32 %v892_v57, %v2567_v15  ;;  %v2599_v5 = vadd.f32 %v638_v52, %v2425_v48 }
 0x1f3   :  { %2037 = vtanh.f32 %v1017_v62  ;;  %1520 = vmatprep.mubr.bf16.mxu0 %v1322_v63  ;;  %v829_v7 = vmul.f32 %v765_v1, %v2589_v45  ;;  %v2603_v9 = vadd.f32 %v640_v60, %v2423_v47  ;;  %v2606_v10 = vadd.f32 %v642_v2, %v2425_v48 }
 0x1f4   :  { %2039 = vtanh.f32 %v1018_v58  ;;  %v1019_v14 = vmul.f32 0.7978846, %v955_v0  ;;  %v1020_v16 = vmul.f32 0.7978846, %v956_v4  ;;  %1521 = vmatmul.mubr.bf16.vlgmr.msra.gmra.mrb[16].mxu0 %v1321_v55  ;;  %v766_v18 = vmul.f32 %v2599_v5, %v2599_v5 }
 0x1f5   :  { %v2613_v19 = vpop.eup %2029  ;;  %v893_v20 = vmul.f32 0.044715, %v829_v7  ;;  %v767_v21 = vmul.f32 %v2603_v9, %v2603_v9  ;;  %v768_v23 = vmul.f32 %v2606_v10, %v2606_v10  ;;  %v1134_v26 = vadd.f32 1.0, %v2537_v42 }
 0x1f6   :  { %2041 = vtanh.f32 %v1019_v14  ;;  %v830_v28 = vmul.f32 %v766_v18, %v2599_v5  ;;  %v1136_v39 = vadd.f32 1.0, %v2551_v59  ;;  %v1133_v32 = vadd.f32 1.0, %v2531_v50  ;;  %v646_v55 = vpop.f32.mrb[40].mxu1 }
 0x1f7   :  { %v2623_v27 = vpop.eup %2031  ;;  %2043 = vtanh.f32 %v1020_v16  ;;  %v957_v6 = vadd.f32 %v893_v20, %v2589_v45  ;;  %v831_v29 = vmul.f32 %v767_v21, %v2603_v9  ;;  %v832_v30 = vmul.f32 %v768_v23, %v2606_v10  ;;  %v648_v31 = vpop.f32.mrb[41].mxu1 }
 0x1f8   :  { %v894_v34 = vmul.f32 0.044715, %v830_v28  ;;  %v1198_v42 = vmul.f32 0.5, %v1134_v26  ;;  %v1200_v40 = vmul.f32 0.5, %v1136_v39  ;;  %v1135_v43 = vadd.f32 1.0, %v2543_v46  ;;  %v650_v38 = vpop.f32.mrb[42].mxu1 }
 0x1f9   :  { %v1021_v59 = vmul.f32 0.7978846, %v957_v6  ;;  %v895_v52 = vmul.f32 0.044715, %v831_v29  ;;  %v896_v50 = vmul.f32 0.044715, %v832_v30  ;;  %v2630_v53 = vadd.f32 %v646_v55, %v2423_v47 }
 0x1fa   :  { %v2632_v54 = vpop.eup %2033  ;;  %v958_v57 = vadd.f32 %v894_v34, %v2599_v5  ;;  %v1262_v60 = vmul.f32 %v1198_v42, %v2457_v12  ;;  %v1264_v62 = vmul.f32 %v1200_v40, %v2469_v22  ;;  %v1197_v63 = vmul.f32 0.5, %v1133_v32  ;;  %v652_v1 = vpop.f32.mrb[43].mxu1 }
 0x1fb   :  { %v2637_v2 = vpop.eup %2035  ;;  %2045 = vtanh.f32 %v1021_v59  ;;  %v959_v46 = vadd.f32 %v895_v52, %v2603_v9  ;;  %v960_v58 = vadd.f32 %v896_v50, %v2606_v10  ;;  %v1199_v0 = vmul.f32 0.5, %v1135_v43 }
 0x1fc   :  { %v1022_v4 = vmul.f32 0.7978846, %v958_v57  ;;  %v1324_v7 = vpack.c.bf16 %v1264_v62, %v1262_v60  ;;  %v1261_v14 = vmul.f32 %v1197_v63, %v2453_v8  ;;  %v769_v16 = vmul.f32 %v2630_v53, %v2630_v53 }
 0x1fd   :  { %v2644_v12 = vpop.eup %2037  ;;  %v1023_v22 = vmul.f32 0.7978846, %v959_v46  ;;  %v1024_v18 = vmul.f32 0.7978846, %v960_v58  ;;  %v1263_v20 = vmul.f32 %v1199_v0, %v2463_v17  ;;  %v2648_v21 = vadd.f32 %v648_v31, %v2425_v48 }
 0x1fe   :  { %v2650_v23 = vpop.eup %2039  ;;  %2047 = vtanh.f32 %v1022_v4  ;;  %1528 = vmatprep.mubr.bf16.mxu0 %v1324_v7  ;;  %v833_v26 = vmul.f32 %v769_v16, %v2630_v53  ;;  %v2654_v8 = vadd.f32 %v650_v38, %v2423_v47  ;;  %v2657_v28 = vadd.f32 %v652_v1, %v2425_v48  ;;  %v656_v39 = vpop.f32.mrb[44].mxu1 }
 0x1ff   :  { %2049 = vtanh.f32 %v1023_v22  ;;  %v1323_v32 = vpack.c.bf16 %v1263_v20, %v1261_v14  ;;  %v770_v17 = vmul.f32 %v2648_v21, %v2648_v21  ;;  %v1138_v55 = vadd.f32 1.0, %v2580_v3  ;;  %v658_v6 = vpop.f32.mrb[45].mxu1 }
 0x200   :  { %v2662_v29 = vpop.eup %2041  ;;  %2051 = vtanh.f32 %v1024_v18  ;;  %v897_v30 = vmul.f32 0.044715, %v833_v26  ;;  %v771_v31 = vmul.f32 %v2654_v8, %v2654_v8  ;;  %v772_v34 = vmul.f32 %v2657_v28, %v2657_v28  ;;  %v660_v42 = vpop.f32.mrb[46].mxu1 }
 0x201   :  { %v2668_v40 = vpop.eup %2043  ;;  %1529 = vmatmul.mubr.bf16.gmra.mrb[20].mxu0 %v1323_v32  ;;  %v834_v43 = vmul.f32 %v770_v17, %v2648_v21  ;;  %v1140_v38 = vadd.f32 1.0, %v2591_v49  ;;  %v1202_v3 = vmul.f32 0.5, %v1138_v55  ;;  %v1137_v59 = vadd.f32 1.0, %v2576_v24  ;;  %v662_v52 = vpop.f32.mrb[47].mxu1 }
 0x202   :  { %v961_v50 = vadd.f32 %v897_v30, %v2630_v53  ;;  %v835_v57 = vmul.f32 %v771_v31, %v2654_v8  ;;  %v836_v60 = vmul.f32 %v772_v34, %v2657_v28  ;;  %v1139_v62 = vadd.f32 1.0, %v2584_v36 }
 0x203   :  { %v898_v63 = vmul.f32 0.044715, %v834_v43  ;;  %v1204_v1 = vmul.f32 0.5, %v1140_v38  ;;  %v1266_v46 = vmul.f32 %v1202_v3, %v2485_v37  ;;  %v1201_v58 = vmul.f32 0.5, %v1137_v59 }
 0x204   :  { %v1025_v0 = vmul.f32 0.7978846, %v961_v50  ;;  %v899_v4 = vmul.f32 0.044715, %v835_v57  ;;  %v900_v49 = vmul.f32 0.044715, %v836_v60  ;;  %v2679_v7 = vadd.f32 %v656_v39, %v2423_v47 }
 0x205   :  { %v2681_v24 = vpop.eup %2045  ;;  %v962_v14 = vadd.f32 %v898_v63, %v2648_v21  ;;  %v1268_v16 = vmul.f32 %v1204_v1, %v2497_v51  ;;  %v1203_v22 = vmul.f32 0.5, %v1139_v62  ;;  %v1265_v36 = vmul.f32 %v1201_v58, %v2481_v33 }
 0x206   :  { %2053 = vtanh.f32 %v1025_v0  ;;  %v963_v18 = vadd.f32 %v899_v4, %v2654_v8  ;;  %v964_v37 = vadd.f32 %v900_v49, %v2657_v28  ;;  %v773_v20 = vmul.f32 %v2679_v7, %v2679_v7  ;;  %v666_v26 = vpop.f32.mrb[48].mxu1 }
 0x207   :  { %v1026_v39 = vmul.f32 0.7978846, %v962_v14  ;;  %v1326_v32 = vpack.c.bf16 %v1268_v16, %v1266_v46  ;;  %v1267_v17 = vmul.f32 %v1203_v22, %v2491_v44  ;;  %v2692_v55 = vadd.f32 %v658_v6, %v2425_v48  ;;  %v668_v51 = vpop.f32.mrb[49].mxu1 }
 0x208   :  { %v2694_v30 = vpop.eup %2047  ;;  %v1027_v33 = vmul.f32 0.7978846, %v963_v18  ;;  %v1028_v31 = vmul.f32 0.7978846, %v964_v37  ;;  %v837_v34 = vmul.f32 %v773_v20, %v2679_v7  ;;  %v2698_v43 = vadd.f32 %v660_v42, %v2423_v47  ;;  %v670_v38 = vpop.f32.mrb[50].mxu1 }
 0x209   :  { %v2700_v3 = vpop.eup %2049  ;;  %2055 = vtanh.f32 %v1026_v39  ;;  %1536 = vmatprep.mubr.bf16.mxu0 %v1326_v32  ;;  %v1325_v59 = vpack.c.bf16 %v1267_v17, %v1265_v36  ;;  %v774_v44 = vmul.f32 %v2692_v55, %v2692_v55  ;;  %v2705_v6 = vadd.f32 %v662_v52, %v2425_v48  ;;  %v672_v50 = vpop.f32.mrb[51].mxu1 }
 0x20a   :  { %v2707_v57 = vpop.eup %2051  ;;  %2057 = vtanh.f32 %v1027_v33  ;;  %v901_v60 = vmul.f32 0.044715, %v837_v34  ;;  %v775_v42 = vmul.f32 %v2698_v43, %v2698_v43  ;;  %v1142_v62 = vadd.f32 1.0, %v2623_v27 }
 0x20b   :  { %2059 = vtanh.f32 %v1028_v31  ;;  %1537 = vmatmul.mubr.bf16.gmra.mrb[24].mxu0 %v1325_v59  ;;  %v838_v63 = vmul.f32 %v774_v44, %v2692_v55  ;;  %v776_v1 = vmul.f32 %v2705_v6, %v2705_v6  ;;  %v1144_v52 = vadd.f32 1.0, %v2637_v2 }
 0x20c   :  { %v965_v46 = vadd.f32 %v901_v60, %v2679_v7  ;;  %v839_v58 = vmul.f32 %v775_v42, %v2698_v43  ;;  %v1206_v0 = vmul.f32 0.5, %v1142_v62  ;;  %v1141_v4 = vadd.f32 1.0, %v2613_v19 }
 0x20d   :  { %v902_v49 = vmul.f32 0.044715, %v838_v63  ;;  %v840_v14 = vmul.f32 %v776_v1, %v2705_v6  ;;  %v1208_v27 = vmul.f32 0.5, %v1144_v52  ;;  %v1143_v16 = vadd.f32 1.0, %v2632_v54 }
 0x20e   :  { %v1029_v22 = vmul.f32 0.7978846, %v965_v46  ;;  %v903_v36 = vmul.f32 0.044715, %v839_v58  ;;  %v1270_v18 = vmul.f32 %v1206_v0, %v2516_v25  ;;  %v1205_v37 = vmul.f32 0.5, %v1141_v4  ;;  %v2722_v20 = vpop.f32.mrb[52].mxu1 }
 0x20f   :  { %v966_v2 = vadd.f32 %v902_v49, %v2692_v55  ;;  %v904_v39 = vmul.f32 0.044715, %v840_v14  ;;  %v1272_v32 = vmul.f32 %v1208_v27, %v2535_v41  ;;  %v1207_v17 = vmul.f32 0.5, %v1143_v16  ;;  %v2726_v19 = vpop.f32.mrb[53].mxu1 }
 0x210   :  { %v2728_v33 = vpop.eup %2053  ;;  %2061 = vtanh.f32 %v1029_v22  ;;  %v967_v54 = vadd.f32 %v903_v36, %v2698_v43  ;;  %v1269_v31 = vmul.f32 %v1205_v37, %v2509_v11  ;;  %v2733_v25 = vadd.f32 %v666_v26, %v2423_v47  ;;  %v2735_v34 = vpop.f32.mrb[54].mxu1 }
 0x211   :  { %v1030_v59 = vmul.f32 0.7978846, %v966_v2  ;;  %v968_v44 = vadd.f32 %v904_v39, %v2705_v6  ;;  %v1328_v60 = vpack.c.bf16 %v1272_v32, %v1270_v18  ;;  %v1271_v41 = vmul.f32 %v1207_v17, %v2529_v35  ;;  %v2739_v42 = vpop.f32.mrb[55].mxu1 }
 0x212   :  { %v1031_v62 = vmul.f32 0.7978846, %v967_v54  ;;  %v777_v63 = vmul.f32 %v2733_v25, %v2733_v25  ;;  %v2744_v1 = vadd.f32 %v668_v51, %v2425_v48  ;;  %v2747_v11 = vadd.f32 %v670_v38, %v2423_v47 }
 0x213   :  { %v2749_v26 = vpop.eup %2055  ;;  %2063 = vtanh.f32 %v1030_v59  ;;  %v1032_v52 = vmul.f32 0.7978846, %v968_v44  ;;  %1544 = vmatprep.mubr.bf16.mxu0 %v1328_v60  ;;  %v1327_v46 = vpack.c.bf16 %v1271_v41, %v1269_v31  ;;  %v2752_v35 = vadd.f32 %v672_v50, %v2425_v48 }
 0x214   :  { %v2754_v58 = vpop.eup %2057  ;;  %2065 = vtanh.f32 %v1031_v62  ;;  %v841_v0 = vmul.f32 %v777_v63, %v2733_v25  ;;  %v778_v51 = vmul.f32 %v2744_v1, %v2744_v1  ;;  %v779_v38 = vmul.f32 %v2747_v11, %v2747_v11 }
 0x215   :  { %v2761_v4 = vpop.eup %2059  ;;  %2067 = vtanh.f32 %v1032_v52  ;;  %1545 = vmatmul.mubr.bf16.gmra.mrb[28].mxu0 %v1327_v46  ;;  %v780_v49 = vmul.f32 %v2752_v35, %v2752_v35  ;;  %v1146_v50 = vadd.f32 1.0, %v2650_v23  ;;  %v1148_v14 = vadd.f32 1.0, %v2668_v40 }
 0x216   :  { %v905_v27 = vmul.f32 0.044715, %v841_v0  ;;  %v842_v16 = vmul.f32 %v778_v51, %v2744_v1  ;;  %v843_v22 = vmul.f32 %v779_v38, %v2747_v11  ;;  %v1145_v36 = vadd.f32 1.0, %v2644_v12  ;;  %v2770_v18 = vpop.f32.mrb[56].mxu1 }
 0x217   :  { %v844_v37 = vmul.f32 %v780_v49, %v2752_v35  ;;  %v1210_v2 = vmul.f32 0.5, %v1146_v50  ;;  %v1212_v39 = vmul.f32 0.5, %v1148_v14  ;;  %v1147_v32 = vadd.f32 1.0, %v2662_v29  ;;  %v2774_v17 = vpop.f32.mrb[57].mxu1 }
 0x218   :  { %v969_v23 = vadd.f32 %v905_v27, %v2733_v25  ;;  %v906_v40 = vmul.f32 0.044715, %v842_v16  ;;  %v907_v54 = vmul.f32 0.044715, %v843_v22  ;;  %v1209_v31 = vmul.f32 0.5, %v1145_v36  ;;  %v2777_v59 = vpop.f32.mrb[58].mxu1 }
 0x219   :  { %v908_v44 = vmul.f32 0.044715, %v844_v37  ;;  %v1274_v12 = vmul.f32 %v1210_v2, %v2555_v61  ;;  %v1276_v60 = vmul.f32 %v1212_v39, %v2567_v15  ;;  %v1211_v41 = vmul.f32 0.5, %v1147_v32  ;;  %v2781_v62 = vpop.f32.mrb[59].mxu1 }
 0x21a   :  { %v2783_v63 = vpop.eup %2061  ;;  %v1033_v29 = vmul.f32 0.7978846, %v969_v23  ;;  %v970_v52 = vadd.f32 %v906_v40, %v2744_v1  ;;  %v971_v46 = vadd.f32 %v907_v54, %v2747_v11  ;;  %v1273_v0 = vmul.f32 %v1209_v31, %v2549_v56 }
 0x21b   :  { %v972_v51 = vadd.f32 %v908_v44, %v2752_v35  ;;  %v1330_v38 = vpack.c.bf16 %v1276_v60, %v1274_v12  ;;  %v1275_v49 = vmul.f32 %v1211_v41, %v2564_v13  ;;  %v2792_v61 = vadd.f32 %v2722_v20, %v2423_v47 }
 0x21c   :  { %2069 = vtanh.f32 %v1033_v29  ;;  %v1034_v15 = vmul.f32 0.7978846, %v970_v52  ;;  %v1035_v50 = vmul.f32 0.7978846, %v971_v46  ;;  %v2796_v14 = vadd.f32 %v2726_v19, %v2425_v48 }
 0x21d   :  { %v2798_v27 = vpop.eup %2063  ;;  %v1036_v16 = vmul.f32 0.7978846, %v972_v51  ;;  %1552 = vmatprep.mubr.bf16.mxu0 %v1330_v38  ;;  %v1329_v56 = vpack.c.bf16 %v1275_v49, %v1273_v0  ;;  %v781_v22 = vmul.f32 %v2792_v61, %v2792_v61  ;;  %v2804_v13 = vadd.f32 %v2735_v34, %v2423_v47 }
 0x21e   :  { %v2806_v20 = vpop.eup %2065  ;;  %2071 = vtanh.f32 %v1034_v15  ;;  %v782_v36 = vmul.f32 %v2796_v14, %v2796_v14  ;;  %v2812_v19 = vadd.f32 %v2739_v42, %v2425_v48  ;;  %v1150_v37 = vadd.f32 1.0, %v2694_v30  ;;  %v2815_v2 = vpop.f32.mrb[60].mxu1 }
 0x21f   :  { %v2817_v39 = vpop.eup %2067  ;;  %2073 = vtanh.f32 %v1035_v50  ;;  %1553 = vmatmul.mubr.bf16.gmra.mrb[32].mxu0 %v1329_v56  ;;  %v845_v34 = vmul.f32 %v781_v22, %v2792_v61  ;;  %v783_v32 = vmul.f32 %v2804_v13, %v2804_v13  ;;  %v1152_v23 = vadd.f32 1.0, %v2707_v57  ;;  %v2823_v40 = vpop.f32.mrb[61].mxu1 }
 0x220   :  { %2075 = vtanh.f32 %v1036_v16  ;;  %v846_v42 = vmul.f32 %v782_v36, %v2796_v14  ;;  %v784_v30 = vmul.f32 %v2812_v19, %v2812_v19  ;;  %v1214_v54 = vmul.f32 0.5, %v1150_v37  ;;  %v2828_v31 = vpop.f32.mrb[62].mxu1 }
 0x221   :  { %v909_v44 = vmul.f32 0.044715, %v845_v34  ;;  %v847_v12 = vmul.f32 %v783_v32, %v2804_v13  ;;  %v1216_v60 = vmul.f32 0.5, %v1152_v23  ;;  %v1149_v41 = vadd.f32 1.0, %v2681_v24  ;;  %v2832_v29 = vpop.f32.mrb[63].mxu1 }
 0x222   :  { %v910_v57 = vmul.f32 0.044715, %v846_v42  ;;  %v848_v52 = vmul.f32 %v784_v30, %v2812_v19  ;;  %v1278_v46 = vmul.f32 %v1214_v54, %v2599_v5  ;;  %v1151_v0 = vadd.f32 1.0, %v2700_v3 }
 0x223   :  { %v973_v51 = vadd.f32 %v909_v44, %v2792_v61  ;;  %v911_v38 = vmul.f32 0.044715, %v847_v12  ;;  %v1280_v49 = vmul.f32 %v1216_v60, %v2606_v10  ;;  %v1213_v15 = vmul.f32 0.5, %v1149_v41 }
 0x224   :  { %v974_v50 = vadd.f32 %v910_v57, %v2796_v14  ;;  %v912_v16 = vmul.f32 0.044715, %v848_v52  ;;  %v1215_v56 = vmul.f32 0.5, %v1151_v0  ;;  %v2842_v24 = vadd.f32 %v2770_v18, %v2423_v47 }
 0x225   :  { %v1037_v22 = vmul.f32 0.7978846, %v973_v51  ;;  %v975_v36 = vadd.f32 %v911_v38, %v2804_v13  ;;  %v1332_v5 = vpack.c.bf16 %v1280_v49, %v1278_v46  ;;  %v1277_v3 = vmul.f32 %v1213_v15, %v2589_v45 }
 0x226   :  { %v2846_v37 = vpop.eup %2069  ;;  %v1038_v34 = vmul.f32 0.7978846, %v974_v50  ;;  %v976_v10 = vadd.f32 %v912_v16, %v2812_v19  ;;  %v1279_v32 = vmul.f32 %v1215_v56, %v2603_v9  ;;  %v785_v23 = vmul.f32 %v2842_v24, %v2842_v24  ;;  %v2852_v42 = vpop.f32.mrb[64].mxu1 }
 0x227   :  { %2077 = vtanh.f32 %v1037_v22  ;;  %v1039_v18 = vmul.f32 0.7978846, %v975_v36  ;;  %1560 = vmatprep.mubr.bf16.mxu0 %v1332_v5  ;;  %v2856_v30 = vadd.f32 %v2774_v17, %v2425_v48  ;;  %v2860_v45 = vadd.f32 %v2777_v59, %v2423_v47  ;;  %v2862_v54 = vpop.f32.mrb[65].mxu1 }
 0x228   :  { %v2864_v44 = vpop.eup %2071  ;;  %2079 = vtanh.f32 %v1038_v34  ;;  %v1040_v9 = vmul.f32 0.7978846, %v976_v10  ;;  %v1331_v12 = vpack.c.bf16 %v1279_v32, %v1277_v3  ;;  %v849_v60 = vmul.f32 %v785_v23, %v2842_v24  ;;  %v2867_v41 = vpop.f32.mrb[66].mxu1 }
 0x229   :  { %v2869_v57 = vpop.eup %2073  ;;  %2081 = vtanh.f32 %v1039_v18  ;;  %v786_v17 = vmul.f32 %v2856_v30, %v2856_v30  ;;  %v787_v59 = vmul.f32 %v2860_v45, %v2860_v45  ;;  %v2877_v52 = vadd.f32 %v2781_v62, %v2425_v48  ;;  %v2879_v46 = vpop.f32.mrb[67].mxu1 }
 0x22a   :  { %v2881_v0 = vpop.eup %2075  ;;  %2083 = vtanh.f32 %v1040_v9  ;;  %1561 = vmatmul.mubr.bf16.gmra.mrb[36].mxu0 %v1331_v12  ;;  %v913_v51 = vmul.f32 0.044715, %v849_v60  ;;  %v1154_v38 = vadd.f32 1.0, %v2749_v26  ;;  %v1156_v49 = vadd.f32 1.0, %v2761_v4 }
 0x22b   :  { %v850_v15 = vmul.f32 %v786_v17, %v2856_v30  ;;  %v851_v50 = vmul.f32 %v787_v59, %v2860_v45  ;;  %v788_v16 = vmul.f32 %v2877_v52, %v2877_v52  ;;  %v1153_v62 = vadd.f32 1.0, %v2728_v33 }
 0x22c   :  { %v977_v56 = vadd.f32 %v913_v51, %v2842_v24  ;;  %v1218_v22 = vmul.f32 0.5, %v1154_v38  ;;  %v1220_v36 = vmul.f32 0.5, %v1156_v49  ;;  %v1155_v5 = vadd.f32 1.0, %v2754_v58 }
 0x22d   :  { %v914_v3 = vmul.f32 0.044715, %v850_v15  ;;  %v915_v34 = vmul.f32 0.044715, %v851_v50  ;;  %v852_v26 = vmul.f32 %v788_v16, %v2877_v52  ;;  %v1217_v4 = vmul.f32 0.5, %v1153_v62 }
 0x22e   :  { %v1041_v10 = vmul.f32 0.7978846, %v977_v56  ;;  %v1282_v32 = vmul.f32 %v1218_v22, %v2648_v21  ;;  %v1284_v23 = vmul.f32 %v1220_v36, %v2657_v28  ;;  %v1219_v18 = vmul.f32 0.5, %v1155_v5  ;;  %v2895_v9 = vpop.f32.mrb[68].mxu1 }
 0x22f   :  { %v978_v33 = vadd.f32 %v914_v3, %v2856_v30  ;;  %v979_v12 = vadd.f32 %v915_v34, %v2860_v45  ;;  %v916_v60 = vmul.f32 0.044715, %v852_v26  ;;  %v1281_v58 = vmul.f32 %v1217_v4, %v2630_v53  ;;  %v2900_v17 = vpop.f32.mrb[69].mxu1 }
 0x230   :  { %2085 = vtanh.f32 %v1041_v10  ;;  %v1334_v59 = vpack.c.bf16 %v1284_v23, %v1282_v32  ;;  %v1283_v51 = vmul.f32 %v1219_v18, %v2654_v8  ;;  %v2905_v21 = vadd.f32 %v2815_v2, %v2423_v47  ;;  %v2907_v28 = vpop.f32.mrb[70].mxu1 }
 0x231   :  { %v2909_v38 = vpop.eup %2077  ;;  %v1042_v49 = vmul.f32 0.7978846, %v978_v33  ;;  %v1043_v15 = vmul.f32 0.7978846, %v979_v12  ;;  %v980_v50 = vadd.f32 %v916_v60, %v2877_v52  ;;  %v2914_v53 = vadd.f32 %v2823_v40, %v2425_v48  ;;  %v2916_v16 = vpop.f32.mrb[71].mxu1 }
 0x232   :  { %v2918_v62 = vpop.eup %2079  ;;  %1568 = vmatprep.mubr.bf16.mxu0 %v1334_v59  ;;  %v1333_v8 = vpack.c.bf16 %v1283_v51, %v1281_v58  ;;  %v789_v2 = vmul.f32 %v2905_v21, %v2905_v21  ;;  %v2924_v56 = vadd.f32 %v2828_v31, %v2423_v47  ;;  %v2928_v22 = vadd.f32 %v2832_v29, %v2425_v48 }
 0x233   :  { %v2930_v36 = vpop.eup %2081  ;;  %2087 = vtanh.f32 %v1042_v49  ;;  %v1044_v40 = vmul.f32 0.7978846, %v980_v50  ;;  %v790_v5 = vmul.f32 %v2914_v53, %v2914_v53  ;;  %v1158_v3 = vadd.f32 1.0, %v2798_v27 }
 0x234   :  { %v2935_v34 = vpop.eup %2083  ;;  %2089 = vtanh.f32 %v1043_v15  ;;  %1569 = vmatmul.mubr.bf16.gmra.mrb[40].mxu0 %v1333_v8  ;;  %v853_v31 = vmul.f32 %v789_v2, %v2905_v21  ;;  %v791_v26 = vmul.f32 %v2924_v56, %v2924_v56  ;;  %v792_v29 = vmul.f32 %v2928_v22, %v2928_v22 }
 0x235   :  { %2091 = vtanh.f32 %v1044_v40  ;;  %v854_v4 = vmul.f32 %v790_v5, %v2914_v53  ;;  %v1160_v10 = vadd.f32 1.0, %v2817_v39  ;;  %v1222_v32 = vmul.f32 0.5, %v1158_v3 }
 0x236   :  { %v917_v23 = vmul.f32 0.044715, %v853_v31  ;;  %v855_v27 = vmul.f32 %v791_v26, %v2924_v56  ;;  %v856_v18 = vmul.f32 %v792_v29, %v2928_v22  ;;  %v1157_v33 = vadd.f32 1.0, %v2783_v63  ;;  %v2947_v12 = vpop.f32.mrb[72].mxu1 }
 0x237   :  { %v918_v60 = vmul.f32 0.044715, %v854_v4  ;;  %v1224_v58 = vmul.f32 0.5, %v1160_v10  ;;  %v1286_v59 = vmul.f32 %v1222_v32, %v2692_v55  ;;  %v1159_v51 = vadd.f32 1.0, %v2806_v20  ;;  %v2951_v49 = vpop.f32.mrb[73].mxu1 }
 0x238   :  { %v981_v39 = vadd.f32 %v917_v23, %v2905_v21  ;;  %v919_v15 = vmul.f32 0.044715, %v855_v27  ;;  %v920_v50 = vmul.f32 0.044715, %v856_v18  ;;  %v1221_v8 = vmul.f32 0.5, %v1157_v33  ;;  %v2954_v2 = vpop.f32.mrb[74].mxu1 }
 0x239   :  { %v982_v40 = vadd.f32 %v918_v60, %v2914_v53  ;;  %v1288_v63 = vmul.f32 %v1224_v58, %v2705_v6  ;;  %v1223_v5 = vmul.f32 0.5, %v1159_v51  ;;  %v2960_v3 = vadd.f32 %v2852_v42, %v2423_v47  ;;  %v2962_v55 = vpop.f32.mrb[75].mxu1 }
 0x23a   :  { %v2964_v20 = vpop.eup %2085  ;;  %v1045_v31 = vmul.f32 0.7978846, %v981_v39  ;;  %v983_v26 = vadd.f32 %v919_v15, %v2924_v56  ;;  %v984_v29 = vadd.f32 %v920_v50, %v2928_v22  ;;  %v1285_v4 = vmul.f32 %v1221_v8, %v2679_v7 }
 0x23b   :  { %v1046_v10 = vmul.f32 0.7978846, %v982_v40  ;;  %v1336_v32 = vpack.c.bf16 %v1288_v63, %v1286_v59  ;;  %v1287_v6 = vmul.f32 %v1223_v5, %v2698_v43  ;;  %v793_v23 = vmul.f32 %v2960_v3, %v2960_v3 }
 0x23c   :  { %2093 = vtanh.f32 %v1045_v31  ;;  %v1047_v42 = vmul.f32 0.7978846, %v983_v26  ;;  %v1048_v27 = vmul.f32 0.7978846, %v984_v29  ;;  %v2974_v18 = vadd.f32 %v2862_v54, %v2425_v48 }
 0x23d   :  { %v2976_v33 = vpop.eup %2087  ;;  %2095 = vtanh.f32 %v1046_v10  ;;  %1576 = vmatprep.mubr.bf16.mxu0 %v1336_v32  ;;  %v1335_v60 = vpack.c.bf16 %v1287_v6, %v1285_v4  ;;  %v857_v7 = vmul.f32 %v793_v23, %v2960_v3  ;;  %v2981_v43 = vadd.f32 %v2867_v41, %v2423_v47 }
 0x23e   :  { %v2983_v58 = vpop.eup %2089  ;;  %2097 = vtanh.f32 %v1047_v42  ;;  %v794_v59 = vmul.f32 %v2974_v18, %v2974_v18  ;;  %v2989_v54 = vadd.f32 %v2879_v46, %v2425_v48  ;;  %v1162_v51 = vadd.f32 1.0, %v2864_v44  ;;  %v2992_v39 = vpop.f32.mrb[76].mxu1 }
 0x23f   :  { %v2994_v15 = vpop.eup %2091  ;;  %2099 = vtanh.f32 %v1048_v27  ;;  %1577 = vmatmul.mubr.bf16.gmra.mrb[44].mxu0 %v1335_v60  ;;  %v921_v41 = vmul.f32 0.044715, %v857_v7  ;;  %v795_v50 = vmul.f32 %v2981_v43, %v2981_v43  ;;  %v1164_v8 = vadd.f32 1.0, %v2881_v0  ;;  %v2999_v40 = vpop.f32.mrb[77].mxu1 }
 0x240   :  { %v858_v63 = vmul.f32 %v794_v59, %v2974_v18  ;;  %v796_v46 = vmul.f32 %v2989_v54, %v2989_v54  ;;  %v1226_v44 = vmul.f32 0.5, %v1162_v51  ;;  %v1161_v5 = vadd.f32 1.0, %v2846_v37  ;;  %v3005_v31 = vpop.f32.mrb[78].mxu1 }
 0x241   :  { %v985_v26 = vadd.f32 %v921_v41, %v2960_v3  ;;  %v859_v29 = vmul.f32 %v795_v50, %v2981_v43  ;;  %v1228_v4 = vmul.f32 0.5, %v1164_v8  ;;  %v1163_v10 = vadd.f32 1.0, %v2869_v57  ;;  %v3010_v0 = vpop.f32.mrb[79].mxu1 }
 0x242   :  { %v922_v32 = vmul.f32 0.044715, %v858_v63  ;;  %v860_v6 = vmul.f32 %v796_v46, %v2989_v54  ;;  %v1290_v23 = vmul.f32 %v1226_v44, %v2744_v1  ;;  %v1225_v42 = vmul.f32 0.5, %v1161_v5 }
 0x243   :  { %v1049_v27 = vmul.f32 0.7978846, %v985_v26  ;;  %v923_v60 = vmul.f32 0.044715, %v859_v29  ;;  %v1292_v37 = vmul.f32 %v1228_v4, %v2752_v35  ;;  %v1227_v7 = vmul.f32 0.5, %v1163_v10 }
 0x244   :  { %v986_v59 = vadd.f32 %v922_v32, %v2974_v18  ;;  %v924_v51 = vmul.f32 0.044715, %v860_v6  ;;  %v1289_v41 = vmul.f32 %v1225_v42, %v2733_v25  ;;  %v3019_v57 = vadd.f32 %v2895_v9, %v2423_v47 }
 0x245   :  { %2101 = vtanh.f32 %v1049_v27  ;;  %v987_v50 = vadd.f32 %v923_v60, %v2981_v43  ;;  %v1338_v8 = vpack.c.bf16 %v1292_v37, %v1290_v23  ;;  %v1291_v1 = vmul.f32 %v1227_v7, %v2747_v11 }
 0x246   :  { %v3023_v63 = vpop.eup %2093  ;;  %v1050_v46 = vmul.f32 0.7978846, %v986_v59  ;;  %v988_v35 = vadd.f32 %v924_v51, %v2989_v54  ;;  %v797_v44 = vmul.f32 %v3019_v57, %v3019_v57  ;;  %v3030_v25 = vadd.f32 %v2900_v17, %v2425_v48 }
 0x247   :  { %v3032_v9 = vpop.eup %2095  ;;  %v1051_v5 = vmul.f32 0.7978846, %v987_v50  ;;  %1584 = vmatprep.mubr.bf16.mxu0 %v1338_v8  ;;  %v1337_v26 = vpack.c.bf16 %v1291_v1, %v1289_v41  ;;  %v3036_v11 = vadd.f32 %v2907_v28, %v2423_v47  ;;  %v3040_v29 = vadd.f32 %v2916_v16, %v2425_v48 }
 0x248   :  { %v3042_v4 = vpop.eup %2097  ;;  %2103 = vtanh.f32 %v1050_v46  ;;  %v1052_v10 = vmul.f32 0.7978846, %v988_v35  ;;  %v861_v17 = vmul.f32 %v797_v44, %v3019_v57  ;;  %v798_v32 = vmul.f32 %v3030_v25, %v3030_v25 }
 0x249   :  { %v3047_v6 = vpop.eup %2099  ;;  %2105 = vtanh.f32 %v1051_v5  ;;  %1585 = vmatmul.mubr.bf16.gmra.mrb[48].mxu0 %v1337_v26  ;;  %v799_v28 = vmul.f32 %v3036_v11, %v3036_v11  ;;  %v800_v16 = vmul.f32 %v3040_v29, %v3040_v29  ;;  %v1166_v23 = vadd.f32 1.0, %v2918_v62 }
 0x24a   :  { %2107 = vtanh.f32 %v1052_v10  ;;  %v925_v42 = vmul.f32 0.044715, %v861_v17  ;;  %v862_v27 = vmul.f32 %v798_v32, %v3030_v25  ;;  %v1168_v60 = vadd.f32 1.0, %v2935_v34 }
 0x24b   :  { %v863_v37 = vmul.f32 %v799_v28, %v3036_v11  ;;  %v864_v7 = vmul.f32 %v800_v16, %v3040_v29  ;;  %v1230_v59 = vmul.f32 0.5, %v1166_v23  ;;  %v1165_v51 = vadd.f32 1.0, %v2909_v38 }
 0x24c   :  { %v989_v41 = vadd.f32 %v925_v42, %v3019_v57  ;;  %v926_v50 = vmul.f32 0.044715, %v862_v27  ;;  %v1232_v8 = vmul.f32 0.5, %v1168_v60  ;;  %v1167_v1 = vadd.f32 1.0, %v2930_v36 }
 0x24d   :  { %v927_v62 = vmul.f32 0.044715, %v863_v37  ;;  %v928_v46 = vmul.f32 0.044715, %v864_v7  ;;  %v1294_v35 = vmul.f32 %v1230_v59, %v2796_v14  ;;  %v1229_v44 = vmul.f32 0.5, %v1165_v51 }
 0x24e   :  { %v1053_v5 = vmul.f32 0.7978846, %v989_v41  ;;  %v990_v34 = vadd.f32 %v926_v50, %v3030_v25  ;;  %v1296_v26 = vmul.f32 %v1232_v8, %v2812_v19  ;;  %v1231_v10 = vmul.f32 0.5, %v1167_v1 }
 0x24f   :  { %v3064_v17 = vpop.eup %2101  ;;  %v991_v38 = vadd.f32 %v927_v62, %v3036_v11  ;;  %v992_v32 = vadd.f32 %v928_v46, %v3040_v29  ;;  %v1293_v28 = vmul.f32 %v1229_v44, %v2792_v61  ;;  %v3071_v36 = vadd.f32 %v2947_v12, %v2423_v47 }
 0x250   :  { %2109 = vtanh.f32 %v1053_v5  ;;  %v1054_v14 = vmul.f32 0.7978846, %v990_v34  ;;  %v1340_v16 = vpack.c.bf16 %v1296_v26, %v1294_v35  ;;  %v1295_v23 = vmul.f32 %v1231_v10, %v2804_v13 }
 0x251   :  { %v1055_v42 = vmul.f32 0.7978846, %v991_v38  ;;  %v1056_v19 = vmul.f32 0.7978846, %v992_v32  ;;  %v801_v27 = vmul.f32 %v3071_v36, %v3071_v36  ;;  %v3078_v60 = vadd.f32 %v2951_v49, %v2425_v48 }
 0x252   :  { %v3080_v37 = vpop.eup %2103  ;;  %2111 = vtanh.f32 %v1054_v14  ;;  %1592 = vmatprep.mubr.bf16.mxu0 %v1340_v16  ;;  %v1339_v61 = vpack.c.bf16 %v1295_v23, %v1293_v28  ;;  %v3084_v12 = vadd.f32 %v2954_v2, %v2423_v47  ;;  %v3088_v13 = vadd.f32 %v2962_v55, %v2425_v48 }
 0x253   :  { %v3090_v7 = vpop.eup %2105  ;;  %2113 = vtanh.f32 %v1055_v42  ;;  %v865_v59 = vmul.f32 %v801_v27, %v3071_v36  ;;  %v802_v49 = vmul.f32 %v3078_v60, %v3078_v60  ;;  %v1170_v51 = vadd.f32 1.0, %v2976_v33 }
 0x254   :  { %v3096_v41 = vpop.eup %2107  ;;  %2115 = vtanh.f32 %v1056_v19  ;;  %1593 = vmatmul.mubr.bf16.gmra.mrb[52].mxu0 %v1339_v61  ;;  %v803_v2 = vmul.f32 %v3084_v12, %v3084_v12  ;;  %v804_v55 = vmul.f32 %v3088_v13, %v3088_v13  ;;  %v1172_v50 = vadd.f32 1.0, %v2994_v15 }
 0x255   :  { %v929_v8 = vmul.f32 0.044715, %v865_v59  ;;  %v866_v1 = vmul.f32 %v802_v49, %v3078_v60  ;;  %v1234_v62 = vmul.f32 0.5, %v1170_v51  ;;  %v1169_v46 = vadd.f32 1.0, %v2964_v20 }
 0x256   :  { %v867_v33 = vmul.f32 %v803_v2, %v3084_v12  ;;  %v868_v35 = vmul.f32 %v804_v55, %v3088_v13  ;;  %v1236_v44 = vmul.f32 0.5, %v1172_v50  ;;  %v1171_v5 = vadd.f32 1.0, %v2983_v58 }
 0x257   :  { %v993_v34 = vadd.f32 %v929_v8, %v3071_v36  ;;  %v930_v26 = vmul.f32 0.044715, %v866_v1  ;;  %v1298_v10 = vmul.f32 %v1234_v62, %v2856_v30  ;;  %v1233_v38 = vmul.f32 0.5, %v1169_v46 }
 0x258   :  { %v931_v15 = vmul.f32 0.044715, %v867_v33  ;;  %v932_v32 = vmul.f32 0.044715, %v868_v35  ;;  %v1300_v28 = vmul.f32 %v1236_v44, %v2877_v52  ;;  %v1235_v14 = vmul.f32 0.5, %v1171_v5 }
 0x259   :  { %v1057_v16 = vmul.f32 0.7978846, %v993_v34  ;;  %v994_v20 = vadd.f32 %v930_v26, %v3078_v60  ;;  %v1297_v23 = vmul.f32 %v1233_v38, %v2842_v24  ;;  %v3115_v42 = vadd.f32 %v2992_v39, %v2423_v47 }
 0x25a   :  { %v3117_v58 = vpop.eup %2109  ;;  %v995_v19 = vadd.f32 %v931_v15, %v3084_v12  ;;  %v996_v30 = vadd.f32 %v932_v32, %v3088_v13  ;;  %v1342_v27 = vpack.c.bf16 %v1300_v28, %v1298_v10  ;;  %v1299_v61 = vmul.f32 %v1235_v14, %v2860_v45 }
 0x25b   :  { %2117 = vtanh.f32 %v1057_v16  ;;  %v1058_v52 = vmul.f32 0.7978846, %v994_v20  ;;  %v805_v59 = vmul.f32 %v3115_v42, %v3115_v42  ;;  %v3126_v24 = vadd.f32 %v2999_v40, %v2425_v48 }
 0x25c   :  { %v3128_v39 = vpop.eup %2111  ;;  %v1059_v49 = vmul.f32 0.7978846, %v995_v19  ;;  %v1060_v51 = vmul.f32 0.7978846, %v996_v30  ;;  %1600 = vmatprep.mubr.bf16.mxu0 %v1342_v27  ;;  %v1341_v2 = vpack.c.bf16 %v1299_v61, %v1297_v23  ;;  %v3132_v55 = vadd.f32 %v3005_v31, %v2423_v47 }
 0x25d   :  { %v3134_v45 = vpop.eup %2113  ;;  %2119 = vtanh.f32 %v1058_v52  ;;  %v869_v50 = vmul.f32 %v805_v59, %v3115_v42  ;;  %v806_v8 = vmul.f32 %v3126_v24, %v3126_v24  ;;  %v3141_v40 = vadd.f32 %v3010_v0, %v2425_v48 }
 0x25e   :  { %v2116_v1 = vpop.eup %2115  ;;  %2121 = vtanh.f32 %v1059_v49  ;;  %1601 = vmatmul.mubr.bf16.gmra.mrb[56].mxu0 %v1341_v2  ;;  %v807_v62 = vmul.f32 %v3132_v55, %v3132_v55  ;;  %v1174_v47 = vadd.f32 1.0, %v3032_v9  ;;  %v1176_v31 = vadd.f32 1.0, %v3047_v6 }
 0x25f   :  { %2123 = vtanh.f32 %v1060_v51  ;;  %v933_v46 = vmul.f32 0.044715, %v869_v50  ;;  %v870_v33 = vmul.f32 %v806_v8, %v3126_v24  ;;  %v808_v35 = vmul.f32 %v3141_v40, %v3141_v40 }
 0x260   :  { %v871_v48 = vmul.f32 %v807_v62, %v3132_v55  ;;  %v1238_v0 = vmul.f32 0.5, %v1174_v47  ;;  %v1240_v44 = vmul.f32 0.5, %v1176_v31  ;;  %v1173_v5 = vadd.f32 1.0, %v3023_v63 }
 0x261   :  { %v997_v34 = vadd.f32 %v933_v46, %v3115_v42  ;;  %v934_v26 = vmul.f32 0.044715, %v870_v33  ;;  %v872_v9 = vmul.f32 %v808_v35, %v3141_v40  ;;  %v1175_v6 = vadd.f32 1.0, %v3042_v4 }
 0x262   :  { %v935_v10 = vmul.f32 0.044715, %v871_v48  ;;  %v1302_v38 = vmul.f32 %v1238_v0, %v2914_v53  ;;  %v1304_v15 = vmul.f32 %v1240_v44, %v2928_v22  ;;  %v1237_v32 = vmul.f32 0.5, %v1173_v5 }
 0x263   :  { %v1061_v28 = vmul.f32 0.7978846, %v997_v34  ;;  %v998_v14 = vadd.f32 %v934_v26, %v3126_v24  ;;  %v936_v16 = vmul.f32 0.044715, %v872_v9  ;;  %v1239_v20 = vmul.f32 0.5, %v1175_v6 }
 0x264   :  { %v999_v63 = vadd.f32 %v935_v10, %v3132_v55  ;;  %v1344_v23 = vpack.c.bf16 %v1304_v15, %v1302_v38  ;;  %v1301_v19 = vmul.f32 %v1237_v32, %v2905_v21  ;;  %v1178_v30 = vadd.f32 1.0, %v3080_v37 }
 0x265   :  { %v2118_v27 = vpop.eup %2117  ;;  %2125 = vtanh.f32 %v1061_v28  ;;  %v1062_v4 = vmul.f32 0.7978846, %v998_v14  ;;  %v1000_v53 = vadd.f32 %v936_v16, %v3141_v40  ;;  %v1303_v22 = vmul.f32 %v1239_v20, %v2924_v56 }
 0x266   :  { %v1063_v61 = vmul.f32 0.7978846, %v999_v63  ;;  %1608 = vmatprep.mubr.bf16.mxu0 %v1344_v23  ;;  %v1180_v52 = vadd.f32 1.0, %v3096_v41  ;;  %v1242_v59 = vmul.f32 0.5, %v1178_v30  ;;  %v1177_v49 = vadd.f32 1.0, %v3064_v17 }
 0x267   :  { %v2120_v51 = vpop.eup %2119  ;;  %2127 = vtanh.f32 %v1062_v4  ;;  %v1064_v2 = vmul.f32 0.7978846, %v1000_v53  ;;  %v1343_v21 = vpack.c.bf16 %v1303_v22, %v1301_v19  ;;  %v1179_v37 = vadd.f32 1.0, %v3090_v7 }
 0x268   :  { %v2122_v50 = vpop.eup %2121  ;;  %2129 = vtanh.f32 %v1063_v61  ;;  %v1244_v8 = vmul.f32 0.5, %v1180_v52  ;;  %v1306_v62 = vmul.f32 %v1242_v59, %v2974_v18  ;;  %v1241_v47 = vmul.f32 0.5, %v1177_v49 }
 0x269   :  { %v2124_v56 = vpop.eup %2123  ;;  %2131 = vtanh.f32 %v1064_v2  ;;  %1609 = vmatmul.mubr.bf16.gmra.mrb[60].mxu0 %v1343_v21  ;;  %v1243_v31 = vmul.f32 0.5, %v1179_v37  ;;  %v1182_v41 = vadd.f32 1.0, %v3128_v39  ;;  %v1184_v46 = vadd.f32 1.0, %v2116_v1  ;;  %v3188_v21 = vld [vmem:[%s3324_s6] ss:$0 sm:$0xff] }
 0x26a   :  { %v1308_v17 = vmul.f32 %v1244_v8, %v2989_v54  ;;  %v1305_v33 = vmul.f32 %v1241_v47, %v2960_v3  ;;  %v1181_v35 = vadd.f32 1.0, %v3117_v58  ;;  %v1183_v7 = vadd.f32 1.0, %v3134_v45 }
 0x26b   :  { %v1307_v48 = vmul.f32 %v1243_v31, %v2981_v43  ;;  %v1246_v0 = vmul.f32 0.5, %v1182_v41  ;;  %v1248_v18 = vmul.f32 0.5, %v1184_v46  ;;  %v1186_v44 = vadd.f32 1.0, %v2120_v51 }
 0x26c   :  { %v1346_v5 = vpack.c.bf16 %v1308_v17, %v1306_v62  ;;  %v1245_v34 = vmul.f32 0.5, %v1181_v35  ;;  %v1247_v26 = vmul.f32 0.5, %v1183_v7  ;;  %v1188_v9 = vadd.f32 1.0, %v2124_v56 }
 0x26d   :  { %v1345_v6 = vpack.c.bf16 %v1307_v48, %v1305_v33  ;;  %v1310_v39 = vmul.f32 %v1246_v0, %v3030_v25  ;;  %v1312_v54 = vmul.f32 %v1248_v18, %v3040_v29  ;;  %v1250_v1 = vmul.f32 0.5, %v1186_v44 }
 0x26e   :  { %1616 = vmatprep.mubr.bf16.mxu0 %v1346_v5  ;;  %v1309_v3 = vmul.f32 %v1245_v34, %v3019_v57  ;;  %v1311_v58 = vmul.f32 %v1247_v26, %v3036_v11  ;;  %v1252_v45 = vmul.f32 0.5, %v1188_v9  ;;  %v1185_v43 = vadd.f32 1.0, %v2118_v27 }
 0x26f   :  { %v2126_v10 = vpop.eup %2125  ;;  %v1348_v38 = vpack.c.bf16 %v1312_v54, %v1310_v39  ;;  %v1314_v15 = vmul.f32 %v1250_v1, %v3078_v60  ;;  %v1187_v32 = vadd.f32 1.0, %v2122_v50 }
 0x270   :  { %v1347_v28 = vpack.c.bf16 %v1311_v58, %v1309_v3  ;;  %v1316_v14 = vmul.f32 %v1252_v45, %v3088_v13  ;;  %v1249_v16 = vmul.f32 0.5, %v1185_v43  ;;  %v1189_v25 = vadd.f32 1.0, %v2126_v10 }
 0x271   :  { %v2128_v20 = vpop.eup %2127  ;;  %1617 = vmatmul.mubr.bf16.gmra.mrb[64].mxu0 %v1345_v6  ;;  %v1251_v29 = vmul.f32 0.5, %v1187_v32 }
 0x272   :  { %v2130_v63 = vpop.eup %2129  ;;  %1624 = vmatprep.mubr.bf16.mxu0 %v1348_v38  ;;  %v1350_v57 = vpack.c.bf16 %v1316_v14, %v1314_v15  ;;  %v1190_v23 = vadd.f32 1.0, %v2128_v20  ;;  %v1313_v19 = vmul.f32 %v1249_v16, %v3071_v36  ;;  %v1253_v60 = vmul.f32 0.5, %v1189_v25 }
 0x273   :  { %v2132_v11 = vpop.eup %2131  ;;  %v1315_v30 = vmul.f32 %v1251_v29, %v3084_v12  ;;  %v1191_v27 = vadd.f32 1.0, %v2130_v63 }
 0x274   :  { %v1192_v4 = vadd.f32 1.0, %v2132_v11  ;;  %v1254_v53 = vmul.f32 0.5, %v1190_v23  ;;  %v1317_v52 = vmul.f32 %v1253_v60, %v3115_v42 }
 0x275   :  { %v1349_v22 = vpack.c.bf16 %v1315_v30, %v1313_v19  ;;  %v1255_v13 = vmul.f32 0.5, %v1191_v27 }
 0x276   :  { %v1256_v61 = vmul.f32 0.5, %v1192_v4  ;;  %v1318_v49 = vmul.f32 %v1254_v53, %v3126_v24 }
 0x277   :  { %v1319_v59 = vmul.f32 %v1255_v13, %v3132_v55 }
 0x278   :  { %v1320_v51 = vmul.f32 %v1256_v61, %v3141_v40 }
 0x279   :  { %1625 = vmatmul.mubr.bf16.gmra.mrb[68].mxu0 %v1347_v28  ;;  %v1351_v2 = vpack.c.bf16 %v1319_v59, %v1317_v52 }
 0x27a   :  { %1632 = vmatprep.mubr.bf16.mxu0 %v1350_v57  ;;  %v1352_v36 = vpack.c.bf16 %v1320_v51, %v1318_v49 }
 0x281   :  { %1633 = vmatmul.mubr.bf16.gmra.mrb[72].mxu0 %v1349_v22 }
 0x282   :  { %1640 = vmatprep.mubr.bf16.mxu0 %v1352_v36 }
 0x289   :  { %1641 = vmatmul.mubr.bf16.gmra.mrb[76].mxu0 %v1351_v2 }
 0x2c7   :  { %v1793_v12 = vpop.f32.mrb[16].mxu0 }
 0x2c8   :  { %v1794_v42 = vpop.f32.mrb[17].mxu0 }
 0x2c9   :  { %v1795_v37 = vadd.f32 %v1794_v42, %v1793_v12  ;;  %v1796_v55 = vpop.f32.mrb[18].mxu0 }
 0x2ca   :  { %v1797_v50 = vpop.f32.mrb[19].mxu0 }
 0x2cb   :  { %v1523_v24 = vadd.f32 %v1795_v37, %v3188_v21  ;;  %v1798_v40 = vadd.f32 %v1797_v50, %v1796_v55 }
 0x2cd   :  { %1649 = vst [vmem:[%s3325_s7] sm:$0xff] %v1523_v24  ;;  %v1526_v8 = vadd.f32 %v1798_v40, %v3188_v21 }
 0x2cf   :  { %1650 = vst [vmem:[%s3325_s7 + $0x8] sm:$0xff] %v1526_v8 }
 0x2d4   :  { %v1799_v62 = vpop.f32.mrb[20].mxu0 }
 0x2d5   :  { %v1800_v47 = vpop.f32.mrb[21].mxu0 }
 0x2d6   :  { %v1801_v56 = vadd.f32 %v1800_v47, %v1799_v62  ;;  %v1802_v31 = vpop.f32.mrb[22].mxu0 }
 0x2d7   :  { %v1803_v41 = vpop.f32.mrb[23].mxu0 }
 0x2d8   :  { %v1531_v46 = vadd.f32 %v1801_v56, %v3188_v21  ;;  %v1804_v17 = vadd.f32 %v1803_v41, %v1802_v31 }
 0x2da   :  { %1651 = vst [vmem:[%s3325_s7 + $0x10] sm:$0xff] %v1531_v46  ;;  %v1534_v33 = vadd.f32 %v1804_v17, %v3188_v21 }
 0x2dc   :  { %1652 = vst [vmem:[%s3325_s7 + $0x18] sm:$0xff] %v1534_v33 }
 0x2de   :  { %v1805_v35 = vpop.f32.mrb[24].mxu0 }
 0x2df   :  { %v1806_v7 = vpop.f32.mrb[25].mxu0 }
 0x2e0   :  { %v1807_v48 = vadd.f32 %v1806_v7, %v1805_v35  ;;  %v1808_v0 = vpop.f32.mrb[26].mxu0 }
 0x2e1   :  { %v1809_v18 = vpop.f32.mrb[27].mxu0 }
 0x2e2   :  { %v1539_v44 = vadd.f32 %v1807_v48, %v3188_v21  ;;  %v1810_v5 = vadd.f32 %v1809_v18, %v1808_v0 }
 0x2e4   :  { %1653 = vst [vmem:[%s3325_s7 + $0x20] sm:$0xff] %v1539_v44  ;;  %v1542_v34 = vadd.f32 %v1810_v5, %v3188_v21 }
 0x2e6   :  { %1654 = vst [vmem:[%s3325_s7 + $0x28] sm:$0xff] %v1542_v34 }
 0x2e8   :  { %v1811_v26 = vpop.f32.mrb[28].mxu0 }
 0x2e9   :  { %v1812_v9 = vpop.f32.mrb[29].mxu0 }
 0x2ea   :  { %v1813_v6 = vadd.f32 %v1812_v9, %v1811_v26  ;;  %v1814_v39 = vpop.f32.mrb[30].mxu0 }
 0x2eb   :  { %v1815_v54 = vpop.f32.mrb[31].mxu0 }
 0x2ec   :  { %v1547_v1 = vadd.f32 %v1813_v6, %v3188_v21  ;;  %v1816_v3 = vadd.f32 %v1815_v54, %v1814_v39 }
 0x2ee   :  { %1655 = vst [vmem:[%s3325_s7 + $0x30] sm:$0xff] %v1547_v1  ;;  %v1550_v58 = vadd.f32 %v1816_v3, %v3188_v21 }
 0x2f0   :  { %1656 = vst [vmem:[%s3325_s7 + $0x38] sm:$0xff] %v1550_v58 }
 0x2f2   :  { %v1817_v45 = vpop.f32.mrb[32].mxu0 }
 0x2f3   :  { %v1818_v43 = vpop.f32.mrb[33].mxu0 }
 0x2f4   :  { %v1819_v10 = vadd.f32 %v1818_v43, %v1817_v45  ;;  %v1820_v38 = vpop.f32.mrb[34].mxu0 }
 0x2f5   :  { %v1821_v15 = vpop.f32.mrb[35].mxu0 }
 0x2f6   :  { %v1555_v32 = vadd.f32 %v1819_v10, %v3188_v21  ;;  %v1822_v28 = vadd.f32 %v1821_v15, %v1820_v38 }
 0x2f8   :  { %1657 = vst [vmem:[%s3325_s7 + $0x40] sm:$0xff] %v1555_v32  ;;  %v1558_v14 = vadd.f32 %v1822_v28, %v3188_v21 }
 0x2fa   :  { %1658 = vst [vmem:[%s3325_s7 + $0x48] sm:$0xff] %v1558_v14 }
 0x2fd   :  { %v1823_v16 = vpop.f32.mrb[36].mxu0 }
 0x2fe   :  { %v1824_v25 = vpop.f32.mrb[37].mxu0 }
 0x2ff   :  { %v1825_v20 = vadd.f32 %v1824_v25, %v1823_v16  ;;  %v1826_v29 = vpop.f32.mrb[38].mxu0 }
 0x300   :  { %v1827_v63 = vpop.f32.mrb[39].mxu0 }
 0x301   :  { %v1563_v57 = vadd.f32 %v1825_v20, %v3188_v21  ;;  %v1828_v23 = vadd.f32 %v1827_v63, %v1826_v29 }
 0x303   :  { %1659 = vst [vmem:[%s3325_s7 + $0x50] sm:$0xff] %v1563_v57  ;;  %v1566_v11 = vadd.f32 %v1828_v23, %v3188_v21 }
 0x305   :  { %1660 = vst [vmem:[%s3325_s7 + $0x58] sm:$0xff] %v1566_v11 }
 0x307   :  { %v1829_v19 = vpop.f32.mrb[40].mxu0 }
 0x308   :  { %v1830_v30 = vpop.f32.mrb[41].mxu0 }
 0x309   :  { %v1831_v27 = vadd.f32 %v1830_v30, %v1829_v19  ;;  %v1832_v60 = vpop.f32.mrb[42].mxu0 }
 0x30a   :  { %v1833_v4 = vpop.f32.mrb[43].mxu0 }
 0x30b   :  { %v1571_v53 = vadd.f32 %v1831_v27, %v3188_v21  ;;  %v1834_v22 = vadd.f32 %v1833_v4, %v1832_v60 }
 0x30d   :  { %1661 = vst [vmem:[%s3325_s7 + $0x60] sm:$0xff] %v1571_v53  ;;  %v1574_v13 = vadd.f32 %v1834_v22, %v3188_v21 }
 0x30f   :  { %1662 = vst [vmem:[%s3325_s7 + $0x68] sm:$0xff] %v1574_v13 }
 0x312   :  { %v1835_v61 = vpop.f32.mrb[44].mxu0 }
 0x313   :  { %v1836_v52 = vpop.f32.mrb[45].mxu0 }
 0x314   :  { %v1837_v59 = vadd.f32 %v1836_v52, %v1835_v61  ;;  %v1838_v49 = vpop.f32.mrb[46].mxu0 }
 0x315   :  { %v1839_v51 = vpop.f32.mrb[47].mxu0 }
 0x316   :  { %v1579_v2 = vadd.f32 %v1837_v59, %v3188_v21  ;;  %v1840_v36 = vadd.f32 %v1839_v51, %v1838_v49 }
 0x318   :  { %1663 = vst [vmem:[%s3325_s7 + $0x70] sm:$0xff] %v1579_v2  ;;  %v1582_v12 = vadd.f32 %v1840_v36, %v3188_v21 }
 0x31a   :  { %1664 = vst [vmem:[%s3325_s7 + $0x78] sm:$0xff] %v1582_v12 }
 0x31c   :  { %v1841_v42 = vpop.f32.mrb[48].mxu0 }
 0x31d   :  { %v1842_v37 = vpop.f32.mrb[49].mxu0 }
 0x31e   :  { %v1843_v55 = vadd.f32 %v1842_v37, %v1841_v42  ;;  %v1844_v50 = vpop.f32.mrb[50].mxu0 }
 0x31f   :  { %v1845_v24 = vpop.f32.mrb[51].mxu0 }
 0x320   :  { %v1587_v40 = vadd.f32 %v1843_v55, %v3188_v21  ;;  %v1846_v8 = vadd.f32 %v1845_v24, %v1844_v50 }
 0x322   :  { %1665 = vst [vmem:[%s3325_s7 + $0x80] sm:$0xff] %v1587_v40  ;;  %v1590_v62 = vadd.f32 %v1846_v8, %v3188_v21 }
 0x324   :  { %1666 = vst [vmem:[%s3325_s7 + $0x88] sm:$0xff] %v1590_v62 }
 0x327   :  { %v1847_v47 = vpop.f32.mrb[52].mxu0 }
 0x328   :  { %v1848_v56 = vpop.f32.mrb[53].mxu0 }
 0x329   :  { %v1849_v31 = vadd.f32 %v1848_v56, %v1847_v47  ;;  %v1850_v41 = vpop.f32.mrb[54].mxu0 }
 0x32a   :  { %v1851_v46 = vpop.f32.mrb[55].mxu0 }
 0x32b   :  { %v1595_v17 = vadd.f32 %v1849_v31, %v3188_v21  ;;  %v1852_v33 = vadd.f32 %v1851_v46, %v1850_v41 }
 0x32d   :  { %1667 = vst [vmem:[%s3325_s7 + $0x90] sm:$0xff] %v1595_v17  ;;  %v1598_v35 = vadd.f32 %v1852_v33, %v3188_v21 }
 0x32f   :  { %1668 = vst [vmem:[%s3325_s7 + $0x98] sm:$0xff] %v1598_v35 }
 0x331   :  { %v1853_v7 = vpop.f32.mrb[56].mxu0 }
 0x332   :  { %v1854_v48 = vpop.f32.mrb[57].mxu0 }
 0x333   :  { %v1855_v0 = vadd.f32 %v1854_v48, %v1853_v7  ;;  %v1856_v18 = vpop.f32.mrb[58].mxu0 }
 0x334   :  { %v1857_v44 = vpop.f32.mrb[59].mxu0 }
 0x335   :  { %v1603_v5 = vadd.f32 %v1855_v0, %v3188_v21  ;;  %v1858_v34 = vadd.f32 %v1857_v44, %v1856_v18 }
 0x337   :  { %1669 = vst [vmem:[%s3325_s7 + $0xa0] sm:$0xff] %v1603_v5  ;;  %v1606_v26 = vadd.f32 %v1858_v34, %v3188_v21 }
 0x339   :  { %1670 = vst [vmem:[%s3325_s7 + $0xa8] sm:$0xff] %v1606_v26 }
 0x33c   :  { %v1859_v9 = vpop.f32.mrb[60].mxu0 }
 0x33d   :  { %v1860_v6 = vpop.f32.mrb[61].mxu0 }
 0x33e   :  { %v1861_v39 = vadd.f32 %v1860_v6, %v1859_v9  ;;  %v1862_v54 = vpop.f32.mrb[62].mxu0 }
 0x33f   :  { %v1863_v1 = vpop.f32.mrb[63].mxu0 }
 0x340   :  { %v1611_v3 = vadd.f32 %v1861_v39, %v3188_v21  ;;  %v1864_v58 = vadd.f32 %v1863_v1, %v1862_v54 }
 0x342   :  { %1671 = vst [vmem:[%s3325_s7 + $0xb0] sm:$0xff] %v1611_v3  ;;  %v1614_v45 = vadd.f32 %v1864_v58, %v3188_v21 }
 0x344   :  { %1672 = vst [vmem:[%s3325_s7 + $0xb8] sm:$0xff] %v1614_v45  ;;  %v1865_v43 = vpop.f32.mrb[64].mxu0 }
 0x345   :  { %v1866_v10 = vpop.f32.mrb[65].mxu0 }
 0x346   :  { %v1867_v38 = vadd.f32 %v1866_v10, %v1865_v43  ;;  %v1868_v15 = vpop.f32.mrb[66].mxu0 }
 0x347   :  { %v1869_v32 = vpop.f32.mrb[67].mxu0 }
 0x348   :  { %v1619_v28 = vadd.f32 %v1867_v38, %v3188_v21  ;;  %v1870_v14 = vadd.f32 %v1869_v32, %v1868_v15 }
 0x34a   :  { %1673 = vst [vmem:[%s3325_s7 + $0xc0] sm:$0xff] %v1619_v28  ;;  %v1622_v16 = vadd.f32 %v1870_v14, %v3188_v21 }
 0x34c   :  { %1674 = vst [vmem:[%s3325_s7 + $0xc8] sm:$0xff] %v1622_v16  ;;  %v1871_v25 = vpop.f32.mrb[68].mxu0 }
 0x34d   :  { %v1872_v20 = vpop.f32.mrb[69].mxu0 }
 0x34e   :  { %v1873_v29 = vadd.f32 %v1872_v20, %v1871_v25  ;;  %v1874_v63 = vpop.f32.mrb[70].mxu0 }
 0x34f   :  { %v1875_v57 = vpop.f32.mrb[71].mxu0 }
 0x350   :  { %v1627_v23 = vadd.f32 %v1873_v29, %v3188_v21  ;;  %v1876_v11 = vadd.f32 %v1875_v57, %v1874_v63 }
 0x352   :  { %1675 = vst [vmem:[%s3325_s7 + $0xd0] sm:$0xff] %v1627_v23  ;;  %v1630_v19 = vadd.f32 %v1876_v11, %v3188_v21 }
 0x354   :  { %1676 = vst [vmem:[%s3325_s7 + $0xd8] sm:$0xff] %v1630_v19  ;;  %v1877_v30 = vpop.f32.mrb[72].mxu0 }
 0x355   :  { %v1878_v27 = vpop.f32.mrb[73].mxu0 }
 0x356   :  { %v1879_v60 = vadd.f32 %v1878_v27, %v1877_v30  ;;  %v1880_v4 = vpop.f32.mrb[74].mxu0 }
 0x357   :  { %v1881_v53 = vpop.f32.mrb[75].mxu0 }
 0x358   :  { %v1635_v22 = vadd.f32 %v1879_v60, %v3188_v21  ;;  %v1882_v13 = vadd.f32 %v1881_v53, %v1880_v4 }
 0x35a   :  { %1677 = vst [vmem:[%s3325_s7 + $0xe0] sm:$0xff] %v1635_v22  ;;  %v1638_v61 = vadd.f32 %v1882_v13, %v3188_v21 }
 0x35c   :  { %1678 = vst [vmem:[%s3325_s7 + $0xe8] sm:$0xff] %v1638_v61  ;;  %v1883_v52 = vpop.f32.mrb[76].mxu0 }
 0x35d   :  { %v1884_v59 = vpop.f32.mrb[77].mxu0 }
 0x35e   :  { %v1885_v49 = vadd.f32 %v1884_v59, %v1883_v52  ;;  %v1886_v51 = vpop.f32.mrb[78].mxu0 }
 0x35f   :  { %v1887_v2 = vpop.f32.mrb[79].mxu0 }
 0x360   :  { %v1643_v36 = vadd.f32 %v1885_v49, %v3188_v21  ;;  %v1888_v12 = vadd.f32 %v1887_v2, %v1886_v51 }
 0x362   :  { %1679 = vst [vmem:[%s3325_s7 + $0xf0] sm:$0xff] %v1643_v36  ;;  %v1646_v42 = vadd.f32 %v1888_v12, %v3188_v21 }
 0x364   :  { %1680 = vst [vmem:[%s3325_s7 + $0xf8] sm:$0xff] %v1646_v42 }

</bundles_post_ra>
